<compile_context>
chip_gen: v7x
topology: tpu7x:2x2x1
jax: 0.10.0
libtpu: 0.0.40
codegen_flags: <defaults>
</compile_context>

<pallas_src>
import functools

import jax
import jax.numpy as jnp
from jax.experimental import pallas as pl
from jax.experimental.pallas import tpu as pltpu


def _wavenet_block_kernel(x_ref, wdil_ref, bdil_ref, wcomb_ref, bcomb_ref,
                          scale_ref, res_ref, skip_ref, *, conv_len, dilation,
                          c_in, c_res_pad, mxu_dtype, stack_taps):
    nb = x_ref.shape[0]
    t = x_ref.shape[-1]
    # Time index as a single-sublane iota (no modulo): each block covers whole
    # sequences, so the lane index *is* the time index.
    pos = jax.lax.broadcasted_iota(jnp.int32, (1, t), 1)
    b_dil = bdil_ref[...]              # (c_out, 1)            f32
    b_comb = bcomb_ref[...]            # (c_res_pad+c_skip, 1) f32
    scale = scale_ref[...]             # (c_in, 1)             f32
    w_comb = wcomb_ref[...]            # (c_res_pad+c_skip, c_out) mxu_dtype

    for b in range(nb):                # nb is small & static (capped in wrapper)
        xf = x_ref[b].astype(jnp.float32)            # (c_in, t)

        # Causal dilated taps: tap_k[:, t'] = x[:, t' - (K-1-k)*dilation],
        # zero where t' < shift.  One XLU lane-roll + one select per tap.
        taps = []
        for k in range(conv_len):
            s = (conv_len - 1 - k) * dilation
            if s == 0:
                taps.append(xf)
            elif s < t:
                taps.append(jnp.where(pos >= s, pltpu.roll(xf, shift=s, axis=1), 0.0))
            else:
                taps.append(None)                    # fully out of range -> zero tap

        if stack_taps:
            # Deep contraction: one fat MXU matmul over a (K*c_in, t) operand.
            stk = [(tp if tp is not None else jnp.zeros_like(xf)).astype(mxu_dtype)
                   for tp in taps]
            y = jnp.dot(wdil_ref[...], jnp.concatenate(stk, axis=0),
                        preferred_element_type=jnp.float32)
        else:
            # Small conv_len*c_in: skip staging entirely; accumulate K depth-c_in
            # matmuls (wins when vst/VMEM traffic binds, per review).
            y = None
            for k, tp in enumerate(taps):
                if tp is None:
                    continue
                p = jnp.dot(wdil_ref[k], tp.astype(mxu_dtype),
                            preferred_element_type=jnp.float32)
                y = p if y is None else y + p
            if y is None:
                y = jnp.zeros((b_dil.shape[0], t), jnp.float32)

        out = jnp.sin(y + b_dil)                     # ClampedSineAct(w0=1, thr=None)

        # Fused (scale*equalize ; skip∘equalize) 1x1 convs: one matmul, then a
        # sublane-tile-aligned split (res rows padded to a multiple of 8).
        comb = jnp.dot(w_comb, out.astype(mxu_dtype),
                       preferred_element_type=jnp.float32) + b_comb
        res_ref[b] = (comb[:c_in, :] + scale * xf).astype(res_ref.dtype)
        skip_ref[b] = comb[c_res_pad:, :].astype(skip_ref.dtype)


def _round_up(v, m):
    return -(-v // m) * m


def _est_vmem_bytes(nb, *, t, c_in, c_out, c_skip, c_comb, conv_len,
                    act_itemsize, mxu_itemsize, stack_taps):
    """Rough per-step VMEM bytes: double-buffered in/out blocks + live temps."""
    io = 2 * nb * t * (2 * c_in + c_skip) * act_itemsize           # x, res, skip (x2 bufs)
    live = nb * t * ((2 * c_in + 2 * c_out + c_comb) * 4 + 2 * c_in * mxu_itemsize)
    if stack_taps:
        live += nb * t * conv_len * c_in * mxu_itemsize
    return int(io + live + (2 << 20))                               # weights + headroom


def _pick_batch_block(n, est_fn, budget_bytes, max_nb=8):
    """Largest batch chunk fitting the VMEM budget, preferring >=4 grid steps
    (>=2 per v7x TensorCore) so double-buffering can hide the DMAs."""
    divisors = [d for d in range(1, min(n, max_nb) + 1) if n % d == 0]
    feasible = [d for d in divisors if est_fn(d) <= budget_bytes] or [1]
    for min_steps in (4, 2, 1):
        cands = [d for d in feasible if n // d >= min_steps]
        if cands:
            return max(cands)
    return 1


def wavenet_block_forward(x, scale_arg, params, *, conv_len, dilation,
                          batch_block=None, mxu_dtype=jnp.float32,
                          vmem_budget_bytes=40 * 1024 * 1024):
    """x: (N, C_in, T).  `scale_arg` (FiLM tensor) is unused by the reference forward()."""
    del scale_arg                                   # unused in the reference forward
    n, c_in, t = x.shape
    w_dil = params["w_dil"]                         # (C_out, C_in, K) -- PyTorch layout
    c_out = w_dil.shape[0]
    assert w_dil.shape == (c_out, c_in, conv_len)
    c_skip = params["w_skip"].shape[0]
    scale = params["scale"].astype(jnp.float32)
    hi = jax.lax.Precision.HIGHEST

    # ---- wrapper-side weight fusion (tiny tensors, one-time cost) ----
    if c_in != c_out:                               # equalize_channels = Conv1d(Cout->Cin, 1)
        w_eq = params["w_eq"].astype(jnp.float32)
        b_eq = params["b_eq"].astype(jnp.float32)
        w_res = scale[:, None] * w_eq                                # fold self.scale in
        b_res = scale * b_eq
        w_skp = jnp.dot(params["w_skip"].astype(jnp.float32), w_eq, precision=hi)
        b_skp = (jnp.dot(params["w_skip"].astype(jnp.float32), b_eq, precision=hi)
                 + params["b_skip"].astype(jnp.float32))
    else:                                           # equalize_channels = Identity
        w_res = scale[:, None] * jnp.eye(c_in, dtype=jnp.float32)
        b_res = jnp.zeros((c_in,), jnp.float32)
        w_skp = params["w_skip"].astype(jnp.float32)
        b_skp = params["b_skip"].astype(jnp.float32)

    # Pad the res block of the fused weight to a multiple of 8 rows so the
    # res/skip split of the matmul result falls on a sublane-tile boundary.
    c_res_pad = _round_up(c_in, 8)
    pad_rows = c_res_pad - c_in
    w_comb = jnp.concatenate(
        [w_res, jnp.zeros((pad_rows, c_out), jnp.float32), w_skp], axis=0)
    b_comb = jnp.concatenate(
        [b_res, jnp.zeros((pad_rows,), jnp.float32), b_skp], axis=0).reshape(-1, 1)
    c_comb = c_res_pad + c_skip

    # Dilated-conv weights: stacked single-matmul path only when the contraction
    # is deep enough to pay for staging a (K*C_in, T) operand; otherwise the
    # kernel accumulates K depth-C_in matmuls with no staging at all.
    stack_taps = (conv_len * c_in >= 256) and (c_in % 8 == 0)
    if stack_taps:
        w_dk = jnp.transpose(w_dil, (0, 2, 1)).reshape(c_out, conv_len * c_in)
    else:
        w_dk = jnp.transpose(w_dil, (2, 0, 1))      # (K, C_out, C_in)
    # Pre-cast matmul-operand weights (bf16 recommended on v5e/v6e/v7x: halves
    # the weight DMA and MXU passes; accumulation + elementwise stay f32).
    w_dk = w_dk.astype(mxu_dtype)
    w_comb_m = w_comb.astype(mxu_dtype)
    b_dil = params["b_dil"].astype(jnp.float32).reshape(c_out, 1)
    scale_col = scale.reshape(c_in, 1)

    # ---- lane-dense time axis: right-pad T to a multiple of 128 (zeros on the
    # right are causal-safe; padded outputs are sliced off).  Only triggers for
    # awkward T, so well-shaped inputs pay no extra HBM pass.
    t_pad = max(128, _round_up(t, 128))
    x_k = x if t_pad == t else jnp.pad(x, ((0, 0), (0, 0), (0, t_pad - t)))

    act_itemsize = jnp.dtype(x.dtype).itemsize
    mxu_itemsize = jnp.dtype(mxu_dtype).itemsize
    est = functools.partial(_est_vmem_bytes, t=t_pad, c_in=c_in, c_out=c_out,
                            c_skip=c_skip, c_comb=c_comb, conv_len=conv_len,
                            act_itemsize=act_itemsize, mxu_itemsize=mxu_itemsize,
                            stack_taps=stack_taps)
    nb = batch_block if batch_block is not None else _pick_batch_block(
        n, est, vmem_budget_bytes)
    assert n % nb == 0, "batch_block must divide the batch size"
    vmem_limit = int(min(48 * 1024 * 1024, max(32 * 1024 * 1024, 2 * est(nb))))

    kernel = functools.partial(
        _wavenet_block_kernel, conv_len=conv_len, dilation=dilation, c_in=c_in,
        c_res_pad=c_res_pad, mxu_dtype=mxu_dtype, stack_taps=stack_taps)

    if stack_taps:
        wdil_spec = pl.BlockSpec((c_out, conv_len * c_in), lambda b: (0, 0))
    else:
        wdil_spec = pl.BlockSpec((conv_len, c_out, c_in), lambda b: (0, 0, 0))

    cost = pl.CostEstimate(
        flops=2 * n * t_pad * c_out * (conv_len * c_in + c_comb),
        transcendentals=n * t_pad * c_out,
        bytes_accessed=n * t_pad * (2 * c_in + c_skip) * act_itemsize
        + int(w_dk.size + w_comb_m.size) * mxu_itemsize,
    )

    res_p, skip_p = pl.pallas_call(
        kernel,
        out_shape=(jax.ShapeDtypeStruct((n, c_in, t_pad), x.dtype),
                   jax.ShapeDtypeStruct((n, c_skip, t_pad), x.dtype)),
        grid_spec=pltpu.PrefetchScalarGridSpec(
            num_scalar_prefetch=0,
            grid=(n // nb,),
            in_specs=[
                pl.BlockSpec((nb, c_in, t_pad), lambda b: (b, 0, 0)),   # x (native layout)
                wdil_spec,                                              # dilated conv W
                pl.BlockSpec((c_out, 1), lambda b: (0, 0)),             # dilated conv b
                pl.BlockSpec((c_comb, c_out), lambda b: (0, 0)),        # fused eq/scale/skip W
                pl.BlockSpec((c_comb, 1), lambda b: (0, 0)),            # fused eq/scale/skip b
                pl.BlockSpec((c_in, 1), lambda b: (0, 0)),              # self.scale
            ],
            out_specs=(pl.BlockSpec((nb, c_in, t_pad), lambda b: (b, 0, 0)),
                       pl.BlockSpec((nb, c_skip, t_pad), lambda b: (b, 0, 0))),
        ),
        compiler_params=pltpu.CompilerParams(
            dimension_semantics=("parallel",),
            vmem_limit_bytes=vmem_limit),
        cost_estimate=cost,
    )(x_k, w_dk, b_dil, w_comb_m, b_comb, scale_col)

    if t_pad != t:
        res_p = res_p[..., :t]
        skip_p = skip_p[..., :t]
    return res_p, skip_p


def make_params(key, c_in, c_out, c_skip, conv_len):
    ks = jax.random.split(key, 6)
    s = 0.2
    params = {
        # PyTorch Conv1d layouts
        "w_dil": s * jax.random.normal(ks[0], (c_out, c_in, conv_len), jnp.float32),
        "b_dil": s * jax.random.normal(ks[1], (c_out,), jnp.float32),
        "w_skip": s * jax.random.normal(ks[4], (c_skip, c_in), jnp.float32),
        "b_skip": s * jax.random.normal(ks[5], (c_skip,), jnp.float32),
        # self.scale = Parameter(ones(C_in) * 0.5)
        "scale": 0.5 * jnp.ones((c_in,), jnp.float32),
    }
    if c_in != c_out:                               # equalize_channels Conv1d(Cout->Cin, 1)
        params["w_eq"] = s * jax.random.normal(ks[2], (c_in, c_out), jnp.float32)
        params["b_eq"] = s * jax.random.normal(ks[3], (c_in,), jnp.float32)
    return params


def ref_forward(x, params, *, conv_len, dilation):
    """Pure-JAX reference (unfused, HIGHEST-precision matmuls) for validation."""
    hi = jax.lax.Precision.HIGHEST
    pad = dilation * (conv_len - 1)
    xp = jnp.pad(x, ((0, 0), (0, 0), (pad, 0)))
    y = jax.lax.conv_general_dilated(
        xp, params["w_dil"], window_strides=(1,), padding="VALID",
        rhs_dilation=(dilation,), dimension_numbers=("NCH", "OIH", "NCH"),
        precision=hi)
    y = y + params["b_dil"][None, :, None]
    out = jnp.sin(y)
    c_in = x.shape[1]
    c_out = params["w_dil"].shape[0]
    if c_in != c_out:
        out = (jnp.einsum("io,not->nit", params["w_eq"], out, precision=hi)
               + params["b_eq"][None, :, None])
    res = (out + x) * params["scale"][None, :, None]
    skip = (jnp.einsum("si,nit->nst", params["w_skip"], out, precision=hi)
            + params["b_skip"][None, :, None])
    return res, skip


if __name__ == "__main__":
    configs = [
        # (N, C_in, C_out, C_skip, T, conv_len, dilation)
        dict(N=4, C_IN=8, C_OUT=16, C_SKIP=8, T=256, CONV_LEN=7, DILATION=2),   # equalize path
        dict(N=4, C_IN=8, C_OUT=8, C_SKIP=16, T=256, CONV_LEN=3, DILATION=4),   # identity path
    ]
    key = jax.random.PRNGKey(0)
    for cfg in configs:
        key, kx, kf, kp = jax.random.split(key, 4)
        x = jax.random.normal(kx, (cfg["N"], cfg["C_IN"], cfg["T"]), jnp.float32)
        film = jax.random.normal(kf, (cfg["N"], cfg["C_IN"]), jnp.float32)  # unused FiLM arg
        params = make_params(kp, cfg["C_IN"], cfg["C_OUT"], cfg["C_SKIP"], cfg["CONV_LEN"])

        res, skip = wavenet_block_forward(x, film, params,
                                          conv_len=cfg["CONV_LEN"],
                                          dilation=cfg["DILATION"])
        jax.block_until_ready((res, skip))

        res_ref, skip_ref = ref_forward(x, params, conv_len=cfg["CONV_LEN"],
                                        dilation=cfg["DILATION"])
        # Tolerance covers the TPU MXU default (bf16-operand) matmul precision;
        # a structural bug (wrong shift/mask/fusion) shows up as O(0.3+) errors.
        assert jnp.allclose(res, res_ref, atol=5e-2, rtol=5e-2), "res mismatch"
        assert jnp.allclose(skip, skip_ref, atol=5e-2, rtol=5e-2), "skip mismatch"

    # bf16 MXU-operand path (recommended on v5e/v6e/v7x): looser tolerance,
    # since only the matmul operands are quantized (f32 accumulate/elementwise).
    cfg = configs[0]
    key, kx, kf, kp = jax.random.split(key, 4)
    x = jax.random.normal(kx, (cfg["N"], cfg["C_IN"], cfg["T"]), jnp.float32)
    film = jax.random.normal(kf, (cfg["N"], cfg["C_IN"]), jnp.float32)
    params = make_params(kp, cfg["C_IN"], cfg["C_OUT"], cfg["C_SKIP"], cfg["CONV_LEN"])
    res16, skip16 = wavenet_block_forward(x, film, params, conv_len=cfg["CONV_LEN"],
                                          dilation=cfg["DILATION"],
                                          mxu_dtype=jnp.bfloat16)
    jax.block_until_ready((res16, skip16))
    res_ref, skip_ref = ref_forward(x, params, conv_len=cfg["CONV_LEN"],
                                    dilation=cfg["DILATION"])
    assert jnp.allclose(res16, res_ref, atol=1e-1, rtol=1e-1), "bf16 res mismatch"
    assert jnp.allclose(skip16, skip_ref, atol=1e-1, rtol=1e-1), "bf16 skip mismatch"

    print("KERNEL_OK")
</pallas_src>

<mosaic_0001>
module attributes {stable_mosaic.version = 11 : i64} {
  func.func @_wavenet_block_kernel(%arg0: i32, %arg1: memref<1x8x256xf32, #tpu.memory_space<vmem>>, %arg2: memref<7x16x8xf32, #tpu.memory_space<vmem>>, %arg3: memref<16x1xf32, #tpu.memory_space<vmem>>, %arg4: memref<16x16xf32, #tpu.memory_space<vmem>>, %arg5: memref<16x1xf32, #tpu.memory_space<vmem>>, %arg6: memref<8x1xf32, #tpu.memory_space<vmem>>, %arg7: memref<1x8x256xf32, #tpu.memory_space<vmem>>, %arg8: memref<1x8x256xf32, #tpu.memory_space<vmem>>) attributes {dimension_semantics = [#tpu.dimension_semantics<parallel>], iteration_bounds = array<i64: 4>, scalar_prefetch = 0 : i64, scratch_operands = 0 : i64, tpu.core_type = #tpu.core_type<tc>, window_params = [{transform_indices = @transform_0, window_bounds = array<i64: 1, 8, 256>}, {pipeline_mode = #tpu.pipeline_mode<synchronous>, transform_indices = @transform_1, window_bounds = array<i64: 7, 16, 8>}, {pipeline_mode = #tpu.pipeline_mode<synchronous>, transform_indices = @transform_2, window_bounds = array<i64: 16, 1>}, {pipeline_mode = #tpu.pipeline_mode<synchronous>, transform_indices = @transform_3, window_bounds = array<i64: 16, 16>}, {pipeline_mode = #tpu.pipeline_mode<synchronous>, transform_indices = @transform_4, window_bounds = array<i64: 16, 1>}, {pipeline_mode = #tpu.pipeline_mode<synchronous>, transform_indices = @transform_5, window_bounds = array<i64: 8, 1>}, {transform_indices = @transform_6, window_bounds = array<i64: 1, 8, 256>}, {transform_indices = @transform_7, window_bounds = array<i64: 1, 8, 256>}]} {
    %0 = tpu.iota {dimensions = array<i32: 1>} : vector<1x256xi32>
    %c0 = arith.constant 0 : index
    %c0_0 = arith.constant 0 : index
    %1 = vector.load %arg3[%c0, %c0_0] : memref<16x1xf32, #tpu.memory_space<vmem>>, vector<16x1xf32>
    %c0_1 = arith.constant 0 : index
    %c0_2 = arith.constant 0 : index
    %2 = vector.load %arg5[%c0_1, %c0_2] : memref<16x1xf32, #tpu.memory_space<vmem>>, vector<16x1xf32>
    %c0_3 = arith.constant 0 : index
    %c0_4 = arith.constant 0 : index
    %3 = vector.load %arg6[%c0_3, %c0_4] : memref<8x1xf32, #tpu.memory_space<vmem>>, vector<8x1xf32>
    %c0_5 = arith.constant 0 : index
    %c0_6 = arith.constant 0 : index
    %4 = vector.load %arg4[%c0_5, %c0_6] : memref<16x16xf32, #tpu.memory_space<vmem>>, vector<16x16xf32>
    %c0_7 = arith.constant 0 : index
    %c0_8 = arith.constant 0 : index
    %c0_9 = arith.constant 0 : index
    %5 = vector.load %arg1[%c0_7, %c0_8, %c0_9] : memref<1x8x256xf32, #tpu.memory_space<vmem>>, vector<1x8x256xf32>
    %6 = vector.shape_cast %5 : vector<1x8x256xf32> to vector<8x256xf32>
    %c12_i32 = arith.constant 12 : i32
    %7 = vector.broadcast %c12_i32 : i32 to vector<1x256xi32>
    %8 = arith.cmpi sge, %0, %7 : vector<1x256xi32>
    %c12_i32_10 = arith.constant 12 : i32
    %9 = tpu.dynamic_rotate %6 by %c12_i32_10 dim 1 : vector<8x256xf32>, i32 -> vector<8x256xf32>
    %cst = arith.constant 0.000000e+00 : f32
    %10 = vector.shape_cast %8 : vector<1x256xi1> to vector<1x256xi1>
    %11 = vector.broadcast %10 : vector<1x256xi1> to vector<8x256xi1>
    %12 = vector.broadcast %cst : f32 to vector<8x256xf32>
    %13 = arith.select %11, %9, %12 : vector<8x256xi1>, vector<8x256xf32>
    %c10_i32 = arith.constant 10 : i32
    %14 = vector.broadcast %c10_i32 : i32 to vector<1x256xi32>
    %15 = arith.cmpi sge, %0, %14 : vector<1x256xi32>
    %c10_i32_11 = arith.constant 10 : i32
    %16 = tpu.dynamic_rotate %6 by %c10_i32_11 dim 1 : vector<8x256xf32>, i32 -> vector<8x256xf32>
    %cst_12 = arith.constant 0.000000e+00 : f32
    %17 = vector.shape_cast %15 : vector<1x256xi1> to vector<1x256xi1>
    %18 = vector.broadcast %17 : vector<1x256xi1> to vector<8x256xi1>
    %19 = vector.broadcast %cst_12 : f32 to vector<8x256xf32>
    %20 = arith.select %18, %16, %19 : vector<8x256xi1>, vector<8x256xf32>
    %c8_i32 = arith.constant 8 : i32
    %21 = vector.broadcast %c8_i32 : i32 to vector<1x256xi32>
    %22 = arith.cmpi sge, %0, %21 : vector<1x256xi32>
    %c8_i32_13 = arith.constant 8 : i32
    %23 = tpu.dynamic_rotate %6 by %c8_i32_13 dim 1 : vector<8x256xf32>, i32 -> vector<8x256xf32>
    %cst_14 = arith.constant 0.000000e+00 : f32
    %24 = vector.shape_cast %22 : vector<1x256xi1> to vector<1x256xi1>
    %25 = vector.broadcast %24 : vector<1x256xi1> to vector<8x256xi1>
    %26 = vector.broadcast %cst_14 : f32 to vector<8x256xf32>
    %27 = arith.select %25, %23, %26 : vector<8x256xi1>, vector<8x256xf32>
    %c6_i32 = arith.constant 6 : i32
    %28 = vector.broadcast %c6_i32 : i32 to vector<1x256xi32>
    %29 = arith.cmpi sge, %0, %28 : vector<1x256xi32>
    %c6_i32_15 = arith.constant 6 : i32
    %30 = tpu.dynamic_rotate %6 by %c6_i32_15 dim 1 : vector<8x256xf32>, i32 -> vector<8x256xf32>
    %cst_16 = arith.constant 0.000000e+00 : f32
    %31 = vector.shape_cast %29 : vector<1x256xi1> to vector<1x256xi1>
    %32 = vector.broadcast %31 : vector<1x256xi1> to vector<8x256xi1>
    %33 = vector.broadcast %cst_16 : f32 to vector<8x256xf32>
    %34 = arith.select %32, %30, %33 : vector<8x256xi1>, vector<8x256xf32>
    %c4_i32 = arith.constant 4 : i32
    %35 = vector.broadcast %c4_i32 : i32 to vector<1x256xi32>
    %36 = arith.cmpi sge, %0, %35 : vector<1x256xi32>
    %c4_i32_17 = arith.constant 4 : i32
    %37 = tpu.dynamic_rotate %6 by %c4_i32_17 dim 1 : vector<8x256xf32>, i32 -> vector<8x256xf32>
    %cst_18 = arith.constant 0.000000e+00 : f32
    %38 = vector.shape_cast %36 : vector<1x256xi1> to vector<1x256xi1>
    %39 = vector.broadcast %38 : vector<1x256xi1> to vector<8x256xi1>
    %40 = vector.broadcast %cst_18 : f32 to vector<8x256xf32>
    %41 = arith.select %39, %37, %40 : vector<8x256xi1>, vector<8x256xf32>
    %c2_i32 = arith.constant 2 : i32
    %42 = vector.broadcast %c2_i32 : i32 to vector<1x256xi32>
    %43 = arith.cmpi sge, %0, %42 : vector<1x256xi32>
    %c2_i32_19 = arith.constant 2 : i32
    %44 = tpu.dynamic_rotate %6 by %c2_i32_19 dim 1 : vector<8x256xf32>, i32 -> vector<8x256xf32>
    %cst_20 = arith.constant 0.000000e+00 : f32
    %45 = vector.shape_cast %43 : vector<1x256xi1> to vector<1x256xi1>
    %46 = vector.broadcast %45 : vector<1x256xi1> to vector<8x256xi1>
    %47 = vector.broadcast %cst_20 : f32 to vector<8x256xf32>
    %48 = arith.select %46, %44, %47 : vector<8x256xi1>, vector<8x256xf32>
    %c0_21 = arith.constant 0 : index
    %c0_22 = arith.constant 0 : index
    %c0_23 = arith.constant 0 : index
    %49 = vector.load %arg2[%c0_21, %c0_22, %c0_23] : memref<7x16x8xf32, #tpu.memory_space<vmem>>, vector<1x16x8xf32>
    %50 = vector.shape_cast %49 : vector<1x16x8xf32> to vector<16x8xf32>
    %cst_24 = arith.constant dense<0.000000e+00> : vector<16x256xf32>
    %51 = tpu.matmul %50, %13, %cst_24 {dimension_numbers = #tpu.dot_dimension_numbers<[1], [0], [0], [1], [0, 0, 1, 1], [], []>} : vector<16x8xf32>, vector<8x256xf32>, vector<16x256xf32> -> vector<16x256xf32>
    %c1 = arith.constant 1 : index
    %c0_25 = arith.constant 0 : index
    %c0_26 = arith.constant 0 : index
    %52 = vector.load %arg2[%c1, %c0_25, %c0_26] : memref<7x16x8xf32, #tpu.memory_space<vmem>>, vector<1x16x8xf32>
    %53 = vector.shape_cast %52 : vector<1x16x8xf32> to vector<16x8xf32>
    %cst_27 = arith.constant dense<0.000000e+00> : vector<16x256xf32>
    %54 = tpu.matmul %53, %20, %cst_27 {dimension_numbers = #tpu.dot_dimension_numbers<[1], [0], [0], [1], [0, 0, 1, 1], [], []>} : vector<16x8xf32>, vector<8x256xf32>, vector<16x256xf32> -> vector<16x256xf32>
    %55 = arith.addf %51, %54 : vector<16x256xf32>
    %c2 = arith.constant 2 : index
    %c0_28 = arith.constant 0 : index
    %c0_29 = arith.constant 0 : index
    %56 = vector.load %arg2[%c2, %c0_28, %c0_29] : memref<7x16x8xf32, #tpu.memory_space<vmem>>, vector<1x16x8xf32>
    %57 = vector.shape_cast %56 : vector<1x16x8xf32> to vector<16x8xf32>
    %cst_30 = arith.constant dense<0.000000e+00> : vector<16x256xf32>
    %58 = tpu.matmul %57, %27, %cst_30 {dimension_numbers = #tpu.dot_dimension_numbers<[1], [0], [0], [1], [0, 0, 1, 1], [], []>} : vector<16x8xf32>, vector<8x256xf32>, vector<16x256xf32> -> vector<16x256xf32>
    %59 = arith.addf %55, %58 : vector<16x256xf32>
    %c3 = arith.constant 3 : index
    %c0_31 = arith.constant 0 : index
    %c0_32 = arith.constant 0 : index
    %60 = vector.load %arg2[%c3, %c0_31, %c0_32] : memref<7x16x8xf32, #tpu.memory_space<vmem>>, vector<1x16x8xf32>
    %61 = vector.shape_cast %60 : vector<1x16x8xf32> to vector<16x8xf32>
    %cst_33 = arith.constant dense<0.000000e+00> : vector<16x256xf32>
    %62 = tpu.matmul %61, %34, %cst_33 {dimension_numbers = #tpu.dot_dimension_numbers<[1], [0], [0], [1], [0, 0, 1, 1], [], []>} : vector<16x8xf32>, vector<8x256xf32>, vector<16x256xf32> -> vector<16x256xf32>
    %63 = arith.addf %59, %62 : vector<16x256xf32>
    %c4 = arith.constant 4 : index
    %c0_34 = arith.constant 0 : index
    %c0_35 = arith.constant 0 : index
    %64 = vector.load %arg2[%c4, %c0_34, %c0_35] : memref<7x16x8xf32, #tpu.memory_space<vmem>>, vector<1x16x8xf32>
    %65 = vector.shape_cast %64 : vector<1x16x8xf32> to vector<16x8xf32>
    %cst_36 = arith.constant dense<0.000000e+00> : vector<16x256xf32>
    %66 = tpu.matmul %65, %41, %cst_36 {dimension_numbers = #tpu.dot_dimension_numbers<[1], [0], [0], [1], [0, 0, 1, 1], [], []>} : vector<16x8xf32>, vector<8x256xf32>, vector<16x256xf32> -> vector<16x256xf32>
    %67 = arith.addf %63, %66 : vector<16x256xf32>
    %c5 = arith.constant 5 : index
    %c0_37 = arith.constant 0 : index
    %c0_38 = arith.constant 0 : index
    %68 = vector.load %arg2[%c5, %c0_37, %c0_38] : memref<7x16x8xf32, #tpu.memory_space<vmem>>, vector<1x16x8xf32>
    %69 = vector.shape_cast %68 : vector<1x16x8xf32> to vector<16x8xf32>
    %cst_39 = arith.constant dense<0.000000e+00> : vector<16x256xf32>
    %70 = tpu.matmul %69, %48, %cst_39 {dimension_numbers = #tpu.dot_dimension_numbers<[1], [0], [0], [1], [0, 0, 1, 1], [], []>} : vector<16x8xf32>, vector<8x256xf32>, vector<16x256xf32> -> vector<16x256xf32>
    %71 = arith.addf %67, %70 : vector<16x256xf32>
    %c6 = arith.constant 6 : index
    %c0_40 = arith.constant 0 : index
    %c0_41 = arith.constant 0 : index
    %72 = vector.load %arg2[%c6, %c0_40, %c0_41] : memref<7x16x8xf32, #tpu.memory_space<vmem>>, vector<1x16x8xf32>
    %73 = vector.shape_cast %72 : vector<1x16x8xf32> to vector<16x8xf32>
    %cst_42 = arith.constant dense<0.000000e+00> : vector<16x256xf32>
    %74 = tpu.matmul %73, %6, %cst_42 {dimension_numbers = #tpu.dot_dimension_numbers<[1], [0], [0], [1], [0, 0, 1, 1], [], []>} : vector<16x8xf32>, vector<8x256xf32>, vector<16x256xf32> -> vector<16x256xf32>
    %75 = arith.addf %71, %74 : vector<16x256xf32>
    %76 = vector.broadcast %1 : vector<16x1xf32> to vector<16x256xf32>
    %77 = arith.addf %75, %76 : vector<16x256xf32>
    %78 = math.sin %77 : vector<16x256xf32>
    %cst_43 = arith.constant dense<0.000000e+00> : vector<16x256xf32>
    %79 = tpu.matmul %4, %78, %cst_43 {dimension_numbers = #tpu.dot_dimension_numbers<[1], [0], [0], [1], [0, 0, 1, 1], [], []>} : vector<16x16xf32>, vector<16x256xf32>, vector<16x256xf32> -> vector<16x256xf32>
    %80 = vector.broadcast %2 : vector<16x1xf32> to vector<16x256xf32>
    %81 = arith.addf %79, %80 : vector<16x256xf32>
    %82 = vector.extract_strided_slice %81 {offsets = [0, 0], sizes = [8, 256], strides = [1, 1]} : vector<16x256xf32> to vector<8x256xf32>
    %83 = vector.broadcast %3 : vector<8x1xf32> to vector<8x256xf32>
    %84 = arith.mulf %83, %6 : vector<8x256xf32>
    %85 = arith.addf %82, %84 : vector<8x256xf32>
    %c0_44 = arith.constant 0 : index
    %c0_45 = arith.constant 0 : index
    %c0_46 = arith.constant 0 : index
    %86 = vector.load %arg7[%c0_44, %c0_45, %c0_46] : memref<1x8x256xf32, #tpu.memory_space<vmem>>, vector<1x8x256xf32>
    %87 = vector.shape_cast %86 : vector<1x8x256xf32> to vector<8x256xf32>
    %88 = vector.shape_cast %85 : vector<8x256xf32> to vector<1x8x256xf32>
    tpu.vector_store %arg7[%c0_44, %c0_45, %c0_46], %88 {strides = array<i32>} : memref<1x8x256xf32, #tpu.memory_space<vmem>>, vector<1x8x256xf32>,
    %89 = vector.extract_strided_slice %81 {offsets = [8, 0], sizes = [8, 256], strides = [1, 1]} : vector<16x256xf32> to vector<8x256xf32>
    %c0_47 = arith.constant 0 : index
    %c0_48 = arith.constant 0 : index
    %c0_49 = arith.constant 0 : index
    %90 = vector.load %arg8[%c0_47, %c0_48, %c0_49] : memref<1x8x256xf32, #tpu.memory_space<vmem>>, vector<1x8x256xf32>
    %91 = vector.shape_cast %90 : vector<1x8x256xf32> to vector<8x256xf32>
    %92 = vector.shape_cast %89 : vector<8x256xf32> to vector<1x8x256xf32>
    tpu.vector_store %arg8[%c0_47, %c0_48, %c0_49], %92 {strides = array<i32>} : memref<1x8x256xf32, #tpu.memory_space<vmem>>, vector<1x8x256xf32>,
    return
  }
  func.func @transform_0(%arg0: i32) -> (i32, i32, i32) {
    %c0_i32 = arith.constant 0 : i32
    %c0_i32_0 = arith.constant 0 : i32
    %c0_i32_1 = arith.constant 0 : i32
    return %arg0, %c0_i32, %c0_i32_0 : i32, i32, i32
  }
  func.func @transform_1(%arg0: i32) -> (i32, i32, i32) {
    %c0_i32 = arith.constant 0 : i32
    %c0_i32_0 = arith.constant 0 : i32
    %c0_i32_1 = arith.constant 0 : i32
    %c0_i32_2 = arith.constant 0 : i32
    return %c0_i32, %c0_i32_0, %c0_i32_1 : i32, i32, i32
  }
  func.func @transform_2(%arg0: i32) -> (i32, i32) {
    %c0_i32 = arith.constant 0 : i32
    %c0_i32_0 = arith.constant 0 : i32
    %c0_i32_1 = arith.constant 0 : i32
    return %c0_i32, %c0_i32_0 : i32, i32
  }
  func.func @transform_3(%arg0: i32) -> (i32, i32) {
    %c0_i32 = arith.constant 0 : i32
    %c0_i32_0 = arith.constant 0 : i32
    %c0_i32_1 = arith.constant 0 : i32
    return %c0_i32, %c0_i32_0 : i32, i32
  }
  func.func @transform_4(%arg0: i32) -> (i32, i32) {
    %c0_i32 = arith.constant 0 : i32
    %c0_i32_0 = arith.constant 0 : i32
    %c0_i32_1 = arith.constant 0 : i32
    return %c0_i32, %c0_i32_0 : i32, i32
  }
  func.func @transform_5(%arg0: i32) -> (i32, i32) {
    %c0_i32 = arith.constant 0 : i32
    %c0_i32_0 = arith.constant 0 : i32
    %c0_i32_1 = arith.constant 0 : i32
    return %c0_i32, %c0_i32_0 : i32, i32
  }
  func.func @transform_6(%arg0: i32) -> (i32, i32, i32) {
    %c0_i32 = arith.constant 0 : i32
    %c0_i32_0 = arith.constant 0 : i32
    %c0_i32_1 = arith.constant 0 : i32
    return %arg0, %c0_i32, %c0_i32_0 : i32, i32, i32
  }
  func.func @transform_7(%arg0: i32) -> (i32, i32, i32) {
    %c0_i32 = arith.constant 0 : i32
    %c0_i32_0 = arith.constant 0 : i32
    %c0_i32_1 = arith.constant 0 : i32
    return %arg0, %c0_i32, %c0_i32_0 : i32, i32, i32
  }
}

</mosaic_0001>

<bundles_post_ra>
// kernel: tpu_custom_call.1
= control target key start
LH: loop header
LB: loop body
LE: loop exit
PB: predicated region body
PF: predicated region fallthrough
CT: control target
= control target key end

     0   :  { %13 = vsyncpa [#allocation3], 0  ;;  %s2545_s0 = inlined_call_operand.vmem [shape: f32[4,8,256], index: 0, kind: input, shape index: {}]   ;;  %s2546_s1 = inlined_call_operand.vmem [shape: f32[7,16,8], index: 1, kind: input, shape index: {}]   ;;  %s2547_s2 = inlined_call_operand.vmem [shape: f32[16,1], index: 2, kind: input, shape index: {}]   ;;  %s2548_s3 = inlined_call_operand.vmem [shape: f32[16,16], index: 3, kind: input, shape index: {}]   ;;  %s2549_s4 = inlined_call_operand.vmem [shape: f32[16,1], index: 4, kind: input, shape index: {}]   ;;  %s2550_s5 = inlined_call_operand.vmem [shape: f32[8,1], index: 5, kind: input, shape index: {}]   ;;  %s2551_s6 = inlined_call_operand.hbm [shape: f32[4,8,256], index: 6, kind: output, shape index: {0}]   ;;  %s2552_s7 = inlined_call_operand.hbm [shape: f32[4,8,256], index: 7, kind: output, shape index: {1}]  }
   0x1   :  { %15 = vsyncpa [#allocation3 + $0x1], 0 }
   0x2   :  { %16 = vsyncpa [#allocation5], 0 }
   0x3   :  { %18 = vsyncpa [#allocation5 + $0x1], 0  ;;  %s2017_s24 = smov 0   ;;  %s2019_s25 = smov 0  }
   0x4   :  { %s2021_s26 = smov 0   ;;  %s2023_s27 = smov 0  }
   0x5 LB: > { %s2038_s28 = sadd.s32 4294967295, %s1959_s27   ;;  %s1674_s29 = sadd.s32 4294967294, %s1959_s27   ;;  %s1959_s27 = sphi %s2023_s27, %s2564_s27   ;;  %s1955_s26 = sphi %s2021_s26, %s2563_s26   ;;  %s1951_s25 = sphi %s2019_s25, %s2562_s25   ;;  %s1947_s24 = sphi %s2017_s24, %s2561_s24  }
   0x6   : > { %s2042_s30 = sadd.s32 1, %s1959_s27   ;;  %s162_s8 = sadd.s32 1, %s1955_s26 }
   0x7   : > { %s159_s9 = ssub.s32 %s1959_s27, %s2042_s30  ;;  %p172_p0 = scmp.ne.s32.totalorder %s1955_s26, %s1951_s25 }
   0x8   : > { %p160_p1 = scmp.eq.s32.totalorder %s159_s9, 0  ;;  %p173_p2 = scmp.eq.s32.totalorder %s2038_s28, 3 }
   0x9   : > { %p178_p3 = scmp.ne.s32.totalorder %s1951_s25, %s1947_s24  ;;  %p179_p4 = scmp.eq.s32.totalorder %s1674_s29, 3 }
   0xa   : > { %s2053_s10 = scalar_select %p160_p1, %s1955_s26, %s162_s8  }
   0xb   : > { %p2055_p5 = por %p173_p2, %p172_p0  ;;  %p2059_p6 = por %p179_p4, %p178_p3 }
   0xc   : > { %p1677_p7 = scmp.ge.s32.totalorder %s1959_s27, 1  ;;  %p246_p8 = scmp.lt.s32.totalorder %s1959_s27, 5 }
   0xe   : > { %p247_p9 = pnand %p1677_p7, %p246_p8 }
   0xf   : > { %p283_p10 = scmp.lt.s32.totalorder (!%p247_p9), %s2038_s28, 3  ;;  %v1961_v0 = vmov (!%p247_p9), 0.0   ;;  %s1962_s18 = smov (!%p247_p9), 10   ;;  %v292_v3 = vld [vmem:[%s2547_s2 + $0x8] sm:$0xff] (!%p247_p9)  ;;  %v291_v4 = vld [vmem:[%s2547_s2] sm:$0xff] (!%p247_p9)  ;;  %v1968_v5 = vmov (!%p247_p9), 0   ;;  %v288_v9 = vlaneseq (!%p247_p9) }
  0x10   : > { %250 = sbr.rel (%p247_p9) target bundleno = 778 (0x30a), region = 44  ;;  %466 = vmatprep.mubr.f32.mxu1 (!%p247_p9), %v1961_v0  ;;  %725 = vmatprep.mubr.f32.mxu0 (!%p247_p9), %v1961_v0  ;;  %s1963_s19 = smov (!%p247_p9), 6   ;;  %v293_v6 = vld [vmem:[%s2549_s4] sm:$0xff] (!%p247_p9)  ;;  %v294_v8 = vld [vmem:[%s2549_s4 + $0x8] sm:$0xff] (!%p247_p9)  ;;  %vm395_vm4 = vcmask (!%p247_p9), 64512   ;;  %v1682_v19 = vld [vmem:[%s2546_s1 + $0x10] sm:$0xff] (!%p247_p9) }
  0x11   : > { %s1964_s20 = smov (!%p247_p9), 4   ;;  %s1965_s21 = smov (!%p247_p9), 12   ;;  %1846 = vset.pattern.permute.xlu1 (!%p247_p9), %v1968_v5  ;;  %1845 = vset.pattern.permute.xlu0 (!%p247_p9), %v1968_v5  ;;  %v295_v7 = vld [vmem:[%s2550_s5] sm:$0xff] (!%p247_p9)  ;;  %v2107_v10 = vand.u32 (!%p247_p9), 127, %v288_v9  ;;  %v1695_v20 = vld [vmem:[%s2546_s1 + $0x30] sm:$0xff] (!%p247_p9)  ;;  %v1683_v25 = vld [vmem:[%s2546_s1 + $0x18] sm:$0xff] (!%p247_p9) }
  0x12   : > { %s1966_s22 = smov (!%p247_p9), 2   ;;  %s1967_s23 = smov (!%p247_p9), 8   ;;  %v1696_v26 = vld [vmem:[%s2546_s1 + $0x38] sm:$0xff] (!%p247_p9)  ;;  %v390_v31 = vld [vmem:[%s2546_s1] sm:$0xff] (!%p247_p9)  ;;  %v391_v37 = vld [vmem:[%s2546_s1 + $0x8] sm:$0xff] (!%p247_p9) }
  0x13   : > { %vm321_vm0 = vcmp.lt.s32.totalorder (!%p247_p9), %v2107_v10, 10  ;;  %vm351_vm1 = vcmp.lt.s32.totalorder (!%p247_p9), %v2107_v10, 6  ;;  %vm315_vm2 = vcmp.ge.s32.totalorder (!%p247_p9), %v2107_v10, 10  ;;  %vm345_vm3 = vcmp.ge.s32.totalorder (!%p247_p9), %v2107_v10, 6  ;;  %v1700_v32 = vld [vmem:[%s2546_s1 + $0x40] sm:$0xff] (!%p247_p9)  ;;  %v1701_v38 = vld [vmem:[%s2546_s1 + $0x48] sm:$0xff] (!%p247_p9) }
  0x14   : > { %vm366_vm5 = vcmp.lt.s32.totalorder (!%p247_p9), %v2107_v10, 4  ;;  %vm360_vm6 = vcmp.ge.s32.totalorder (!%p247_p9), %v2107_v10, 4  ;;  %vm306_vm7 = vcmp.lt.s32.totalorder (!%p247_p9), %v2107_v10, 12  ;;  %vm300_vm8 = vcmp.ge.s32.totalorder (!%p247_p9), %v2107_v10, 12  ;;  %v1690_v43 = vld [vmem:[%s2546_s1 + $0x20] sm:$0xff] (!%p247_p9)  ;;  %v1705_v44 = vld [vmem:[%s2546_s1 + $0x50] sm:$0xff] (!%p247_p9) }
  0x15   : > { %vm381_vm9 = vcmp.lt.s32.totalorder (!%p247_p9), %v2107_v10, 2  ;;  %vm375_vm10 = vcmp.ge.s32.totalorder (!%p247_p9), %v2107_v10, 2  ;;  %vm336_vm11 = vcmp.lt.s32.totalorder (!%p247_p9), %v2107_v10, 8  ;;  %vm330_vm12 = vcmp.ge.s32.totalorder (!%p247_p9), %v2107_v10, 8  ;;  %v1691_v45 = vld [vmem:[%s2546_s1 + $0x28] sm:$0xff] (!%p247_p9)  ;;  %v1706_v46 = vld [vmem:[%s2546_s1 + $0x58] sm:$0xff] (!%p247_p9) }
  0x16   : > { %v1710_v47 = vld [vmem:[%s2546_s1 + $0x60] sm:$0xff] (!%p247_p9)  ;;  %v1711_v48 = vld [vmem:[%s2546_s1 + $0x68] sm:$0xff] (!%p247_p9)  ;;  %s1741_s15 = sshll.u32 (!%p247_p9), %s2038_s28, 8 }
  0x17   : > { %s284_s13 = scalar_select %p283_p10, %s2038_s28, 3 }
  0x18   : > { %s2471_s28 = scalar_lea.hbm %s2551_s6, %s1741_s15  ;;  %s2478_s29 = scalar_lea.hbm %s2552_s7, %s1741_s15 }
  0x19   : > { %s1740_s14 = sshll.u32 %s284_s13, 4  ;;  %s2459_s13 = sand.u32 1, %s1951_s25  }
  0x1a   : > { %s2072_s17 = scalar_lea.vmem %s2545_s0, %s1740_s14  ;;  %s1678_s14 = sshll.u32 %s2459_s13, 4 }
  0x1b   : > { %v2075_v1 = vld [vmem:[%s2072_s17] sm:$0xff]  ;;  %v2080_v2 = vld [vmem:[%s2072_s17 + $0x8] sm:$0xff]  ;;  %s275_s16 = scalar_lea.vmem [#allocation2], %s1678_s14  ;;  %s1550_s8 = scalar_lea.sflag [#allocation3], %s2459_s13 }
  0x1c   : > { %317 = vrot.lane.b32.xlu1 %v2075_v1, %s1962_s18  ;;  %347 = vrot.lane.b32.xlu0 %v2075_v1, %s1963_s19 }
  0x20   : > { %319 = vrot.lane.b32.xlu1 %v2080_v2, %s1962_s18  ;;  %349 = vrot.lane.b32.xlu0 %v2080_v2, %s1963_s19  ;;  %s1569_s18 = sshll.u32 %s275_s16, 4  ;;  %s2465_s19 = scalar_lea.vmem [#allocation4], %s1678_s14  ;;  %s2473_s18 = int_to_ptr.vmem [resolvable:$true] %s1569_s18 }
  0x21   : > { %s1865_s9 = scalar_lea.vmem %s2473_s18, 256  ;;  %s1975_s14 = smov [#allocation2]  }
  0x22   : > { %p1866_p11 = scmp.ne.s32.totalorder %s2473_s18, %s1865_s9 }
  0x24   : > { %364 = vrot.lane.b32.xlu1 %v2080_v2, %s1964_s20  ;;  %362 = vrot.lane.b32.xlu0 %v2075_v1, %s1964_s20  ;;  %s1583_s20 = sshll.u32 %s2465_s19, 4  ;;  %p1867_p12 = pnand %p1866_p11, %p2055_p5  ;;  %s2480_s20 = int_to_ptr.vmem [resolvable:$true] %s1583_s20 }
  0x26   : > { %p1868_p13 = pneg %p1867_p12 }
  0x28   : > { %304 = vrot.lane.b32.xlu1 %v2080_v2, %s1965_s21  ;;  %302 = vrot.lane.b32.xlu0 %v2075_v1, %s1965_s21  ;;  %s1869_s21 = sshll.u32 %s1975_s14, 4  ;;  %s1870_s21 = int_to_ptr.vmem [resolvable:$false] %s1869_s21 }
  0x29   : > { %p1872_p0 = scmp.lt.s32.totalorder %s2473_s18, %s1870_s21 }
  0x2c   : > { %379 = vrot.lane.b32.xlu1 %v2080_v2, %s1966_s22  ;;  %377 = vrot.lane.b32.xlu0 %v2075_v1, %s1966_s22  ;;  %s1871_s22 = scalar_lea.vmem %s1870_s21, 512 }
  0x2d   : > { %p1873_p1 = scmp.lt.s32.totalorder %s1871_s22, %s1865_s9 }
  0x2f   : > { %p1874_p2 = por %p1873_p1, %p1872_p0 }
  0x30   : > { %334 = vrot.lane.b32.xlu1 %v2080_v2, %s1967_s23  ;;  %332 = vrot.lane.b32.xlu0 %v2075_v1, %s1967_s23 }
  0x31   : > { %p1875_p3 = pnand %p1874_p2, %p1868_p13 }
  0x34   : > { %1019 = vperm.xlu1 %1846, %v292_v3   ;;  %1014 = vperm.xlu0 %1845, %v291_v4  }
  0x38   : > { %1444 = vperm.xlu1 %1846, %v293_v6   ;;  %1538 = vperm.xlu0 %1845, %v295_v7  }
  0x3c   : > { %1449 = vperm.xlu1 %1846, %v294_v8  }
  0x8e   : > { %v318_v11 = vpop.permute.xlu1 %317  ;;  %v348_v12 = vpop.permute.xlu0 %347 }
  0x92   : > { %v320_v13 = vpop.permute.xlu1 %319  ;;  %v350_v14 = vpop.permute.xlu0 %349 }
  0x93   : > { %v322_v15 = vsel %vm321_vm0, %v318_v11, %v320_v13  ;;  %v352_v16 = vsel %vm351_vm1, %v348_v12, %v350_v14  ;;  %v323_v17 = vsel %vm321_vm0, %v320_v13, %v318_v11  ;;  %v353_v18 = vsel %vm351_vm1, %v350_v14, %v348_v12 }
  0x94   : > { %402 = vmatprep.subr.mxu1 %v322_v15  ;;  %661 = vmatprep.subr.mxu0 %v352_v16 }
  0x95   : > { %1684 = vmatpush1.msk.msra.mxu1 %vm315_vm2, %v323_v17  ;;  %1697 = vmatpush1.msk.msra.mxu0 %vm345_vm3, %v353_v18 }
  0x96   : > { %1685 = vmatmul.mubr.msk.f32.vlgmr.msra.gmra.mrb[0].mxu1 %vm395_vm4, %v1682_v19  ;;  %v365_v21 = vpop.permute.xlu1 %364  ;;  %1698 = vmatmul.mubr.msk.f32.vlgmr.msra.gmra.mrb[0].mxu0 %vm395_vm4, %v1695_v20  ;;  %v363_v22 = vpop.permute.xlu0 %362 }
  0x97   : > { %v368_v23 = vsel %vm366_vm5, %v365_v21, %v363_v22  ;;  %472 = vmatprep.mubr.f32.mxu1 %v1961_v0  ;;  %731 = vmatprep.mubr.f32.mxu0 %v1961_v0  ;;  %v367_v24 = vsel %vm366_vm5, %v363_v22, %v365_v21 }
  0x98   : > { %751 = vmatprep.subr.mxu0 %v367_v24 }
  0x99   : > { %1702 = vmatpush1.msk.msra.mxu0 %vm360_vm6, %v368_v23 }
  0x9a   : > { %1686 = vmatmul.mubr.msk.f32.gmra.mrb[2].mxu1 %vm395_vm4, %v1683_v25  ;;  %v305_v27 = vpop.permute.xlu1 %304  ;;  %1699 = vmatmul.mubr.msk.f32.gmra.mrb[2].mxu0 %vm395_vm4, %v1696_v26  ;;  %v303_v28 = vpop.permute.xlu0 %302 }
  0x9b   : > { %v308_v29 = vsel %vm306_vm7, %v305_v27, %v303_v28  ;;  %v307_v30 = vsel %vm306_vm7, %v303_v28, %v305_v27  ;;  %549 = vmatprep.mubr.f32.mxu1 %v1961_v0  ;;  %815 = vmatprep.mubr.f32.mxu0 %v1961_v0 }
  0x9c   : > { %485 = vmatprep.subr.mxu1 %v307_v30 }
  0x9d   : > { %1687 = vmatpush1.msk.msra.mxu1 %vm300_vm8, %v308_v29 }
  0x9e   : > { %v380_v33 = vpop.permute.xlu1 %379  ;;  %1688 = vmatmul.mubr.msk.f32.vlgmr.msra.gmra.mrb[0].mxu1 %vm395_vm4, %v390_v31  ;;  %1703 = vmatmul.mubr.msk.f32.vlgmr.msra.gmra.mrb[0].mxu0 %vm395_vm4, %v1700_v32  ;;  %v378_v34 = vpop.permute.xlu0 %377 }
  0x9f   : > { %v383_v35 = vsel %vm381_vm9, %v380_v33, %v378_v34  ;;  %555 = vmatprep.mubr.f32.mxu1 %v1961_v0  ;;  %821 = vmatprep.mubr.f32.mxu0 %v1961_v0  ;;  %v382_v36 = vsel %vm381_vm9, %v378_v34, %v380_v33  ;;  %v1969_v33 = vmov 683565275  }
  0xa0   : > { %841 = vmatprep.subr.mxu0 %v382_v36 }
  0xa1   : > { %1707 = vmatpush1.msk.msra.mxu0 %vm375_vm10, %v383_v35 }
  0xa2   : > { %v335_v39 = vpop.permute.xlu1 %334  ;;  %1689 = vmatmul.mubr.msk.f32.gmra.mrb[2].mxu1 %vm395_vm4, %v391_v37  ;;  %1704 = vmatmul.mubr.msk.f32.gmra.mrb[2].mxu0 %vm395_vm4, %v1701_v38  ;;  %v333_v40 = vpop.permute.xlu0 %332  ;;  %v1970_v37 = vmov 2475754826  }
  0xa3   : > { %v338_v41 = vsel %vm336_vm11, %v335_v39, %v333_v40  ;;  %v337_v42 = vsel %vm336_vm11, %v333_v40, %v335_v39  ;;  %635 = vmatprep.mubr.f32.mxu1 %v1961_v0  ;;  %905 = vmatprep.mubr.f32.mxu0 %v1961_v0  ;;  %v1971_v39 = vmov 2131351028  }
  0xa4   : > { %571 = vmatprep.subr.mxu1 %v337_v42  ;;  %931 = vmatprep.subr.mxu0 %v2080_v2 }
  0xa5   : > { %1692 = vmatpush1.msk.msra.mxu1 %vm330_vm12, %v338_v41  ;;  %v1972_v41 = vmov 2102212464  }
  0xa6   : > { %1693 = vmatmul.mubr.msk.f32.vlgmr.msra.gmra.mrb[0].mxu1 %vm395_vm4, %v1690_v43  ;;  %1708 = vmatmul.mubr.msk.f32.vlgmr.msra.gmra.mrb[0].mxu0 %vm395_vm4, %v1705_v44  ;;  %v1973_v43 = vmov 920167782  }
  0xa7   : > { %641 = vmatprep.mubr.f32.mxu1 %v1961_v0  ;;  %911 = vmatprep.mubr.f32.mxu0 %v1961_v0 }
  0xa8   : > { %932 = vmatpush1.msra.mxu0 %v2075_v1 }
  0xaa   : > { %1694 = vmatmul.mubr.msk.f32.gmra.mrb[2].mxu1 %vm395_vm4, %v1691_v45  ;;  %1709 = vmatmul.mubr.msk.f32.gmra.mrb[2].mxu0 %vm395_vm4, %v1706_v46 }
  0xab   : > { %995 = vmatprep.mubr.f32.mxu0 %v1961_v0  ;;  %1523 = vmatprep.mubr.f32.mxu1 %v1961_v0 }
  0xae   : > { %1712 = vmatmul.mubr.msk.f32.vlgmr.msra.gmra.mrb[0].mxu0 %vm395_vm4, %v1710_v47 }
  0xaf   : > { %1001 = vmatprep.mubr.f32.mxu0 %v1961_v0 }
  0xb2   : > { %1713 = vmatmul.mubr.msk.f32.gmra.mrb[2].mxu0 %vm395_vm4, %v1711_v48 }
  0xb3   : > { %v1015_v54 = vpop.permute.xlu0 %1014  ;;  %v1020_v2 = vpop.permute.xlu1 %1019 }
 0x179   : > { %v637_v49 = vpop.f32.mrb[0].mxu1 }
 0x17a   : > { %v639_v50 = vpop.f32.mrb[1].mxu1 }
 0x17d   : > { %v643_v51 = vpop.f32.mrb[2].mxu1 }
 0x17e   : > { %v645_v52 = vpop.f32.mrb[3].mxu1 }
 0x181   : > { %v997_v53 = vpop.f32.mrb[0].mxu0 }
 0x182   : > { %v1747_v55 = vadd.f32 %v997_v53, %v637_v49  ;;  %v999_v56 = vpop.f32.mrb[1].mxu0 }
 0x183   : > { %v1748_v57 = vadd.f32 %v999_v56, %v639_v50  ;;  %v1974_v50 = vmov 1326507024  }
 0x184   : > { %v2192_v58 = vadd.f32 %v1747_v55, %v1015_v54 }
 0x185   : > { %v2194_v59 = vadd.f32 %v1748_v57, %v1015_v54  ;;  %v1003_v60 = vpop.f32.mrb[2].mxu0 }
 0x186   : > { %v1026_v61 = vand.u32 2147483647, %v2192_v58  ;;  %v1029_v62 = vand.u32 2139095040, %v2192_v58  ;;  %v1749_v63 = vadd.f32 %v1003_v60, %v643_v51  ;;  %v1005_v1 = vpop.f32.mrb[3].mxu0 }
 0x187   : > { %v1130_v3 = vand.u32 2147483647, %v2194_v59  ;;  %v1133_v4 = vand.u32 2139095040, %v2194_v59  ;;  %v1750_v5 = vadd.f32 %v1005_v1, %v645_v52 }
 0x188   : > { %v1030_v6 = vshrl.u32 %v1029_v62, 23  ;;  %v1033_v7 = vand.u32 8388607, %v1026_v61  ;;  %v2202_v8 = vadd.f32 %v1749_v63, %v1020_v2 }
 0x189   : > { %v1134_v9 = vshrl.u32 %v1133_v4, 23  ;;  %v1137_v10 = vand.u32 8388607, %v1130_v3  ;;  %v2208_v17 = vadd.f32 %v1750_v5, %v1020_v2 }
 0x18a   : > { %v1714_v11 = vadd.s32 4294967169, %v1030_v6  ;;  %v1234_v12 = vand.u32 2147483647, %v2202_v8  ;;  %v1237_v14 = vand.u32 2139095040, %v2202_v8  ;;  %v1034_v15 = vor.u32 8388608, %v1033_v7 }
 0x18b   : > { %v1718_v13 = vadd.s32 4294967169, %v1134_v9  ;;  %v1138_v18 = vor.u32 8388608, %v1137_v10  ;;  %v1341_v31 = vand.u32 2139095040, %v2208_v17 }
 0x18c   : > { %v1036_v16 = vadd.s32 1, %v1714_v11  ;;  %v1238_v20 = vshrl.u32 %v1237_v14, 23  ;;  %v2212_v21 = vand.u32 8388607, %v1234_v12  ;;  %v2214_v26 = vshll.u32 %v1034_v15, 8 }
 0x18d   : > { %v1140_v19 = vadd.s32 1, %v1718_v13  ;;  %v2218_v29 = vshll.u32 %v1138_v18, 8 }
 0x18e   : > { %vm1037_vm13 = vcmp.gt.s32.totalorder %v1036_v16, 0  ;;  %v1722_v23 = vadd.s32 4294967169, %v1238_v20  ;;  %v1242_v30 = vor.u32 8388608, %v2212_v21 }
 0x18f   : > { %v1038_v22 = vsel %vm1037_vm13, %v1036_v16, 0  ;;  %vm1141_vm14 = vcmp.gt.s32.totalorder %v1140_v19, 0 }
 0x190   : > { %v1039_v24 = vshrl.u32 %v1038_v22, 5  ;;  %v1040_v25 = vand.u32 31, %v1038_v22  ;;  %v1142_v27 = vsel %vm1141_vm14, %v1140_v19, 0  ;;  %v2223_v36 = vadd.s32 1, %v1722_v23 }
 0x191   : > { %v2216_v28 = vshrl.u32 %v1142_v27, 5  ;;  %v1144_v35 = vand.u32 31, %v1142_v27 }
 0x192   : > { %v1041_v32 = vsub.s32 32, %v1040_v25  ;;  %v1043_v34 = vshll.u32 %v1969_v33, %v1040_v25  ;;  %v1046_v38 = vshll.u32 %v1970_v37, %v1040_v25  ;;  %v1049_v40 = vshll.u32 %v1971_v39, %v1040_v25 }
 0x193   : > { %v1052_v42 = vshll.u32 %v1972_v41, %v1040_v25  ;;  %v1055_v44 = vshll.u32 %v1973_v43, %v1040_v25  ;;  %vm1058_vm15 = vcmp.lt.s32.totalorder %v1039_v24, 1  ;;  %vm1059_vm0 = vcmp.lt.s32.totalorder %v1039_v24, 2 }
 0x194   : > { %v1044_v45 = vshrl.u32 %v1970_v37, %v1041_v32  ;;  %v1047_v46 = vshrl.u32 %v1971_v39, %v1041_v32  ;;  %v1050_v47 = vshrl.u32 %v1972_v41, %v1041_v32  ;;  %v1042_v48 = vshrl.u32 %v1969_v33, %v1041_v32 }
 0x195   : > { %v1053_v49 = vshrl.u32 %v1973_v43, %v1041_v32  ;;  %v1056_v51 = vshrl.u32 %v1974_v50, %v1041_v32  ;;  %v1145_v55 = vsub.s32 32, %v1144_v35  ;;  %vm1060_vm1 = vcmp.lt.s32.totalorder %v1039_v24, 3 }
 0x196   : > { %v1045_v52 = vor.u32 %v1044_v45, %v1043_v34  ;;  %v1048_v53 = vor.u32 %v1047_v46, %v1046_v38  ;;  %v1051_v54 = vor.u32 %v1050_v47, %v1049_v40  ;;  %vm1061_vm2 = vcmp.lt.s32.totalorder %v1039_v24, 4 }
 0x197   : > { %v1054_v56 = vor.u32 %v1053_v49, %v1052_v42  ;;  %v1057_v57 = vor.u32 %v1056_v51, %v1055_v44  ;;  %v1147_v6 = vshll.u32 %v1969_v33, %v1144_v35  ;;  %v1148_v10 = vshrl.u32 %v1970_v37, %v1145_v55 }
 0x198   : > { %v1062_v60 = vsel %vm1058_vm15, %v1042_v48, %v1045_v52  ;;  %v1063_v62 = vsel %vm1061_vm2, %v1051_v54, 2102212464  ;;  %v1066_v63 = vsel %vm1058_vm15, %v1045_v52, %v1048_v53  ;;  %v1070_v1 = vsel %vm1058_vm15, %v1048_v53, %v1051_v54 }
 0x199   : > { %v1064_v2 = vsel %vm1060_vm1, %v1048_v53, %v1063_v62  ;;  %v1067_v4 = vsel %vm1061_vm2, %v1054_v56, 920167782  ;;  %v1071_v5 = vsel %vm1061_vm2, %v1057_v57, 1326507024  ;;  %v1150_v11 = vshll.u32 %v1970_v37, %v1144_v35 }
 0x19a   : > { %v1068_v7 = vsel %vm1060_vm1, %v1051_v54, %v1067_v4  ;;  %v1072_v9 = vsel %vm1060_vm1, %v1054_v56, %v1071_v5  ;;  %v1065_v13 = vsel %vm1059_vm0, %v1062_v60, %v1064_v2  ;;  %v1151_v16 = vshrl.u32 %v1971_v39, %v1145_v55 }
 0x19b   : > { %v1069_v14 = vsel %vm1059_vm0, %v1066_v63, %v1068_v7  ;;  %v1073_v15 = vsel %vm1059_vm0, %v1070_v1, %v1072_v9  ;;  %v1149_v23 = vor.u32 %v1148_v10, %v1147_v6  ;;  %v1153_v27 = vshll.u32 %v1971_v39, %v1144_v35 }
 0x19c   : > { %v2246_v18 = vmul.u32.u64.low %v2214_v26, %v1073_v15  ;;  %v2247_v19 = vmul.u32.u64.high %v2214_v26, %v1073_v15, %v2246_v18  ;;  %v2250_v20 = vmul.u32.u64.low %v2214_v26, %v1069_v14  ;;  %v2251_v22 = vmul.u32.u64.high %v2214_v26, %v1069_v14, %v2250_v20 }
 0x19d   : > { %v1152_v25 = vor.u32 %v1151_v16, %v1150_v11  ;;  %v1154_v32 = vshrl.u32 %v1972_v41, %v1145_v55  ;;  %v1146_v24 = vshrl.u32 %v1969_v33, %v1145_v55  ;;  %v1156_v34 = vshll.u32 %v1972_v41, %v1144_v35 }
 0x19e   : > { %v1157_v38 = vshrl.u32 %v1973_v43, %v1145_v55  ;;  %v1160_v40 = vshrl.u32 %v1974_v50, %v1145_v55  ;;  %v1081_v42 = vmul.u32 %v2214_v26, %v1065_v13  ;;  %v1159_v45 = vshll.u32 %v1973_v43, %v1144_v35 }
 0x19f   : > { %v1155_v44 = vor.u32 %v1154_v32, %v1153_v27  ;;  %vm1162_vm3 = vcmp.lt.s32.totalorder %v2216_v28, 1  ;;  %vm1083_vm4 = vc.u32 %v2247_v19, %v2250_v20  ;;  %v1084_v46 = vadd.s32 1, %v2251_v22 }
 0x1a0   : > { %v1158_v47 = vor.u32 %v1157_v38, %v1156_v34  ;;  %vm1163_vm5 = vcmp.lt.s32.totalorder %v2216_v28, 2  ;;  %v1161_v48 = vor.u32 %v1160_v40, %v1159_v45  ;;  %vm1164_vm6 = vcmp.lt.s32.totalorder %v2216_v28, 3 }
 0x1a1   : > { %vm1165_vm7 = vcmp.lt.s32.totalorder %v2216_v28, 4  ;;  %v1170_v49 = vsel %vm1162_vm3, %v1149_v23, %v1152_v25  ;;  %v1085_v26 = vsel %vm1083_vm4, %v1084_v46, %v2251_v22  ;;  %v1174_v52 = vsel %vm1162_vm3, %v1152_v25, %v1155_v44 }
 0x1a2   : > { %v1167_v51 = vsel %vm1165_vm7, %v1155_v44, 2102212464  ;;  %v1171_v35 = vsel %vm1165_vm7, %v1158_v47, 920167782  ;;  %v1086_v53 = vadd.s32 %v1085_v26, %v1081_v42  ;;  %v1166_v54 = vsel %vm1162_vm3, %v1146_v24, %v1149_v23 }
 0x1a3   : > { %v1172_v55 = vsel %vm1164_vm6, %v1155_v44, %v1171_v35  ;;  %v1175_v56 = vsel %vm1165_vm7, %v1161_v48, 1326507024  ;;  %v1168_v57 = vsel %vm1164_vm6, %v1152_v25, %v1167_v51  ;;  %vm1245_vm8 = vcmp.gt.s32.totalorder %v2223_v36, 0 }
 0x1a4   : > { %v1173_v60 = vsel %vm1163_vm5, %v1170_v49, %v1172_v55  ;;  %v1176_v62 = vsel %vm1164_vm6, %v1158_v47, %v1175_v56  ;;  %v1087_v63 = vadd.s32 536870912, %v1086_v53  ;;  %v1246_v7 = vsel %vm1245_vm8, %v2223_v36, 0 }
 0x1a5   : > { %v1177_v1 = vsel %vm1163_vm5, %v1174_v52, %v1176_v62  ;;  %v2276_v2 = vmul.u32.u64.low %v2218_v29, %v1173_v60  ;;  %v2277_v4 = vmul.u32.u64.high %v2218_v29, %v1173_v60, %v2276_v2  ;;  %v1342_v9 = vshrl.u32 %v1341_v31, 23 }
 0x1a6   : > { %v2281_v5 = vmul.u32.u64.low %v2218_v29, %v1177_v1  ;;  %v2282_v6 = vmul.u32.u64.high %v2218_v29, %v1177_v1, %v2281_v5  ;;  %v2287_v10 = vshrl.u32 %v1087_v63, 30  ;;  %v1169_v11 = vsel %vm1163_vm5, %v1166_v54, %v1168_v57 }
 0x1a7   : > { %v1248_v13 = vand.u32 31, %v1246_v7  ;;  %v1188_v15 = vadd.s32 1, %v2277_v4  ;;  %v2295_v18 = vshll.u32 %v1242_v30, 8  ;;  %v1185_v36 = vmul.u32 %v2218_v29, %v1169_v11 }
 0x1a8   : > { %v1089_v14 = vshll.u32 %v2287_v10, 30  ;;  %vm1187_vm9 = vc.u32 %v2282_v6, %v2276_v2  ;;  %v1247_v31 = vshrl.u32 %v1246_v7, 5  ;;  %v1726_v22 = vadd.s32 4294967169, %v1342_v9 }
 0x1a9   : > { %v1249_v16 = vsub.s32 32, %v1248_v13  ;;  %v1189_v28 = vsel %vm1187_vm9, %v1188_v15, %v2277_v4  ;;  %v1251_v25 = vshll.u32 %v1969_v33, %v1248_v13  ;;  %v1254_v27 = vshll.u32 %v1970_v37, %v1248_v13 }
 0x1aa   : > { %v1090_v23 = vsub.s32 %v1086_v53, %v1089_v14  ;;  %v1190_v32 = vadd.s32 %v1189_v28, %v1185_v36  ;;  %v1257_v30 = vshll.u32 %v1971_v39, %v1248_v13  ;;  %v1260_v38 = vshll.u32 %v1972_v41, %v1248_v13 }
 0x1ab   : > { %v1252_v24 = vshrl.u32 %v1970_v37, %v1249_v16  ;;  %v1255_v21 = vshrl.u32 %v1971_v39, %v1249_v16  ;;  %v1258_v34 = vshrl.u32 %v1972_v41, %v1249_v16  ;;  %v1261_v40 = vshrl.u32 %v1973_v43, %v1249_v16 }
 0x1ac   : > { %v1092_v29 = vsub.s32 0, %v1090_v23  ;;  %v1191_v42 = vadd.s32 536870912, %v1190_v32  ;;  %v1263_v46 = vshll.u32 %v1973_v43, %v1248_v13  ;;  %v1264_v26 = vshrl.u32 %v1974_v50, %v1249_v16 }
 0x1ad   : > { %v1253_v44 = vor.u32 %v1252_v24, %v1251_v25  ;;  %v1256_v45 = vor.u32 %v1255_v21, %v1254_v27  ;;  %v1259_v48 = vor.u32 %v1258_v34, %v1257_v30  ;;  %v1262_v49 = vor.u32 %v1261_v40, %v1260_v38 }
 0x1ae   : > { %v1715_v47 = vmin.u32 %v1092_v29, %v1090_v23  ;;  %v2311_v51 = vshrl.u32 %v1191_v42, 30  ;;  %v1250_v35 = vshrl.u32 %v1969_v33, %v1249_v16  ;;  %vm1266_vm10 = vcmp.lt.s32.totalorder %v1247_v31, 1 }
 0x1af   : > { %vm1267_vm11 = vcmp.lt.s32.totalorder %v1247_v31, 2  ;;  %v1265_v53 = vor.u32 %v1264_v26, %v1263_v46  ;;  %vm1268_vm12 = vcmp.lt.s32.totalorder %v1247_v31, 3  ;;  %vm1269_vm13 = vcmp.lt.s32.totalorder %v1247_v31, 4 }
 0x1b0   : > { %v1094_v52 = vclz %v1715_v47  ;;  %v1193_v54 = vshll.u32 %v2311_v51, 30  ;;  %v1271_v55 = vsel %vm1269_vm13, %v1259_v48, 2102212464  ;;  %v1274_v56 = vsel %vm1266_vm10, %v1253_v44, %v1256_v45 }
 0x1b1   : > { %v1275_v57 = vsel %vm1269_vm13, %v1262_v49, 920167782  ;;  %v1270_v62 = vsel %vm1266_vm10, %v1250_v35, %v1253_v44  ;;  %v1278_v1 = vsel %vm1266_vm10, %v1256_v45, %v1259_v48  ;;  %v1272_v5 = vsel %vm1268_vm12, %v1256_v45, %v1271_v55 }
 0x1b2   : > { %v1716_v60 = vadd.s32 4294967294, %v1094_v52  ;;  %v1276_v63 = vsel %vm1268_vm12, %v1259_v48, %v1275_v57  ;;  %v2315_v4 = vsub.s32 %v1190_v32, %v1193_v54  ;;  %v1279_v9 = vsel %vm1269_vm13, %v1265_v53, 1326507024 }
 0x1b3   : > { %v1277_v7 = vsel %vm1267_vm11, %v1274_v56, %v1276_v63  ;;  %v1280_v11 = vsel %vm1268_vm12, %v1262_v49, %v1279_v9  ;;  %v1082_v15 = vadd.s32 %v2250_v20, %v2247_v19  ;;  %v1273_v32 = vsel %vm1267_vm11, %v1270_v62, %v1272_v5 }
 0x1b4   : > { %vm1717_vm14 = vcmp.lt.s32.totalorder %v1716_v60, 0  ;;  %v2319_v13 = vmul.u32.u64.low %v2295_v18, %v1277_v7  ;;  %v2320_v14 = vmul.u32.u64.high %v2295_v18, %v1277_v7, %v2319_v13  ;;  %v1196_v36 = vsub.s32 0, %v2315_v4 }
 0x1b5   : > { %v1097_v16 = vsel %vm1717_vm14, 0, %v1716_v60  ;;  %v1281_v28 = vsel %vm1267_vm11, %v1278_v1, %v1280_v11  ;;  %v1348_v24 = vadd.s32 1, %v1726_v22  ;;  %v1289_v31 = vmul.u32 %v2295_v18, %v1273_v32 }
 0x1b6   : > { %v1098_v25 = vsub.s32 32, %v1097_v16  ;;  %v1102_v27 = vsub.s32 4294967266, %v1097_v16  ;;  %v1099_v21 = vshll.u32 %v1090_v23, %v1097_v16  ;;  %v1719_v30 = vmin.u32 %v1196_v36, %v2315_v4 }
 0x1b7   : > { %v2330_v29 = vmul.u32.u64.low %v2295_v18, %v1281_v28  ;;  %v2331_v34 = vmul.u32.u64.high %v2295_v18, %v1281_v28, %v2330_v29  ;;  %v1292_v19 = vadd.s32 1, %v2320_v14  ;;  %vm1349_vm15 = vcmp.gt.s32.totalorder %v1348_v24, 0 }
 0x1b8   : > { %v1100_v38 = vshrl.u32 %v1082_v15, %v1098_v25  ;;  %v1103_v40 = vadd.s32 127, %v1102_v27  ;;  %v1350_v20 = vsel %vm1349_vm15, %v1348_v24, 0  ;;  %v1198_v23 = vclz %v1719_v30 }
 0x1b9   : > { %v1352_v45 = vand.u32 31, %v1350_v20  ;;  %vm1291_vm0 = vc.u32 %v2331_v34, %v2319_v13  ;;  %v1338_v49 = vand.u32 2147483647, %v2208_v17  ;;  %v1112_v52 = vsub.s32 4, %v2287_v10 }
 0x1ba   : > { %v1101_v42 = vor.u32 %v1100_v38, %v1099_v21  ;;  %v1104_v44 = vshll.u32 %v1103_v40, 23  ;;  %v1293_v46 = vsel %vm1291_vm0, %v1292_v19, %v2320_v14  ;;  %vm1028_vm1 = vcmp.lt.s32.totalorder %v2192_v58, 0 }
 0x1bb   : > { %v1353_v47 = vsub.s32 32, %v1352_v45  ;;  %v1294_v48 = vadd.s32 %v1293_v46, %v1289_v31  ;;  %vm2343_vm2 = vcmp.le.f32.partialorder %v1026_v61, 0.7853982  ;;  %v1720_v55 = vadd.s32 4294967294, %v1198_v23 }
 0x1bc   : > { %v1105_v22 = vor.u32 4788187, %v1104_v44  ;;  %v1108_v35 = vcvt.s32.f32 %v1101_v42  ;;  %v1345_v60 = vand.u32 8388607, %v1338_v49  ;;  %v1113_v61 = vsel %vm1028_vm1, %v1112_v52, %v2287_v10 }
 0x1bd   : > { %v1295_v53 = vadd.s32 536870912, %v1294_v48  ;;  %v1356_v56 = vshrl.u32 %v1970_v37, %v1353_v47  ;;  %v1359_v62 = vshrl.u32 %v1971_v39, %v1353_v47  ;;  %v1362_v63 = vshrl.u32 %v1972_v41, %v1353_v47 }
 0x1be   : > { %v1106_v26 = vand.u32 2147483647, %v1105_v22  ;;  %v1355_v5 = vshll.u32 %v1969_v33, %v1352_v45  ;;  %v1365_v7 = vshrl.u32 %v1973_v43, %v1353_v47  ;;  %v1351_v11 = vshrl.u32 %v1350_v20, 5 }
 0x1bf   : > { %v2348_v57 = vshrl.u32 %v1295_v53, 30  ;;  %v1358_v14 = vshll.u32 %v1970_v37, %v1352_v45  ;;  %v1361_v15 = vshll.u32 %v1971_v39, %v1352_v45  ;;  %vm1721_vm3 = vcmp.lt.s32.totalorder %v1720_v55, 0 }
 0x1c0   : > { %v1109_v54 = vmul.f32 %v1108_v35, %v1106_v26  ;;  %v1357_v36 = vor.u32 %v1356_v56, %v1355_v5  ;;  %v1364_v28 = vshll.u32 %v1972_v41, %v1352_v45  ;;  %v1367_v37 = vshll.u32 %v1973_v43, %v1352_v45 }
 0x1c1   : > { %v1297_v9 = vshll.u32 %v2348_v57, 30  ;;  %v1360_v27 = vor.u32 %v1359_v62, %v1358_v14  ;;  %v1363_v32 = vor.u32 %v1362_v63, %v1361_v15  ;;  %v1368_v39 = vshrl.u32 %v1974_v50, %v1353_v47 }
 0x1c2   : > { %v1110_v1 = vxor.u32 2147483648, %v1109_v54  ;;  %v1366_v24 = vor.u32 %v1365_v7, %v1364_v28  ;;  %v1346_v30 = vor.u32 8388608, %v1345_v60  ;;  %v2373_v29 = vsel %vm1721_vm3, 0, %v1720_v55 }
 0x1c3   : > { %v2368_v25 = vsub.s32 %v1294_v48, %v1297_v9  ;;  %v1369_v41 = vor.u32 %v1368_v39, %v1367_v37  ;;  %vm1370_vm4 = vcmp.lt.s32.totalorder %v1351_v11, 1  ;;  %v1115_v38 = vsel %vm2343_vm2, 0, %v1113_v61 }
 0x1c4   : > { %v1111_v16 = vsel %vm1028_vm1, %v1110_v1, %v1109_v54  ;;  %v1354_v19 = vshrl.u32 %v1969_v33, %v1353_v47  ;;  %vm1373_vm5 = vcmp.lt.s32.totalorder %v1351_v11, 4  ;;  %v1378_v43 = vsel %vm1370_vm4, %v1357_v36, %v1360_v27 }
 0x1c5   : > { %v1114_v10 = vsel %vm2343_vm2, %v2192_v58, %v1111_v16  ;;  %v1300_v21 = vsub.s32 0, %v2368_v25  ;;  %vm1372_vm6 = vcmp.lt.s32.totalorder %v1351_v11, 3  ;;  %v1379_v50 = vsel %vm1373_vm5, %v1366_v24, 920167782 }
 0x1c6   : > { %1847 = vcosq.f32 %v1114_v10  ;;  %v1382_v20 = vsel %vm1370_vm4, %v1360_v27, %v1363_v32  ;;  %v1383_v42 = vsel %vm1373_vm5, %v1369_v41, 1326507024  ;;  %vm1371_vm7 = vcmp.lt.s32.totalorder %v1351_v11, 2 }
 0x1c7   : > { %1849 = vsinq.f32 %v1114_v10  ;;  %v1723_v40 = vmin.u32 %v1300_v21, %v2368_v25  ;;  %v1375_v45 = vsel %vm1373_vm5, %v1363_v32, 2102212464  ;;  %v1380_v31 = vsel %vm1372_vm6, %v1363_v32, %v1379_v50 }
 0x1c8   : > { %v1381_v22 = vsel %vm1371_vm7, %v1378_v43, %v1380_v31  ;;  %v1384_v23 = vsel %vm1372_vm6, %v1366_v24, %v1383_v42  ;;  %v1386_v46 = vshll.u32 %v1346_v30, 8  ;;  %v1206_v48 = vsub.s32 4294967266, %v2373_v29 }
 0x1c9   : > { %v1302_v44 = vclz %v1723_v40  ;;  %v1374_v33 = vsel %vm1370_vm4, %v1354_v19, %v1357_v36  ;;  %v1385_v47 = vsel %vm1371_vm7, %v1382_v20, %v1384_v23  ;;  %v1376_v35 = vsel %vm1372_vm6, %v1360_v27, %v1375_v45 }
 0x1ca   : > { %v2385_v52 = vmul.u32.u64.low %v1386_v46, %v1385_v47  ;;  %v2386_v53 = vmul.u32.u64.high %v1386_v46, %v1385_v47, %v2385_v52  ;;  %v1119_v18 = vadd.s32 3, %v1115_v38  ;;  %v1377_v61 = vsel %vm1371_vm7, %v1374_v33, %v1376_v35 }
 0x1cb   : > { %v1724_v26 = vadd.s32 4294967294, %v1302_v44  ;;  %v2388_v54 = vmul.u32.u64.low %v1386_v46, %v1381_v22  ;;  %v2389_v55 = vmul.u32.u64.high %v1386_v46, %v1381_v22, %v2388_v54  ;;  %v1207_v7 = vadd.s32 127, %v1206_v48 }
 0x1cc   : > { %v1120_v62 = vand.u32 3, %v1119_v18  ;;  %v1186_v9 = vadd.s32 %v2276_v2, %v2282_v6  ;;  %v1202_v16 = vsub.s32 32, %v2373_v29  ;;  %v1393_v36 = vmul.u32 %v1386_v46, %v1377_v61 }
 0x1cd   : > { %vm1725_vm8 = vcmp.lt.s32.totalorder %v1724_v26, 0  ;;  %vm1395_vm9 = vc.u32 %v2386_v53, %v2388_v54  ;;  %v1396_v15 = vadd.s32 1, %v2389_v55  ;;  %v1208_v32 = vshll.u32 %v1207_v7, 23 }
 0x1ce   : > { %v1305_v60 = vsel %vm1725_vm8, 0, %v1724_v26  ;;  %vm1125_vm10 = vcmp.eq.s32.totalorder %v1120_v62, 2  ;;  %vm1122_vm11 = vcmp.eq.s32.totalorder %v1120_v62, 0  ;;  %vm1121_vm12 = vcmp.lt.s32.totalorder %v1120_v62, 2 }
 0x1cf   : > { %v1310_v1 = vsub.s32 4294967266, %v1305_v60  ;;  %v1306_v10 = vsub.s32 32, %v1305_v60  ;;  %v1397_v27 = vsel %vm1395_vm9, %v1396_v15, %v2389_v55  ;;  %v1290_v2 = vadd.s32 %v2319_v13, %v2331_v34 }
 0x1d0   : > { %v1848_v56 = vpop.eup %1847  ;;  %v1398_v24 = vadd.s32 %v1397_v27, %v1393_v36  ;;  %vm1118_vm13 = vweird.f32 %v2192_v58  ;;  %v1204_v21 = vshrl.u32 %v1186_v9, %v1202_v16  ;;  %v1203_v40 = vshll.u32 %v2315_v4, %v2373_v29 }
 0x1d1   : > { %v1850_v63 = vpop.eup %1849  ;;  %v1126_v5 = vxor.u32 2147483648, %v1848_v56  ;;  %v1311_v14 = vadd.s32 127, %v1310_v1  ;;  %v1308_v38 = vshrl.u32 %v1290_v2, %v1306_v10  ;;  %v1209_v19 = vor.u32 4788187, %v1208_v32 }
 0x1d2   : > { %v1123_v28 = vxor.u32 2147483648, %v1850_v63  ;;  %v1399_v30 = vadd.s32 536870912, %v1398_v24  ;;  %v1307_v50 = vshll.u32 %v2368_v25, %v1305_v60  ;;  %v1205_v42 = vor.u32 %v1204_v21, %v1203_v40 }
 0x1d3   : > { %v1127_v11 = vsel %vm1125_vm10, %v1126_v5, %v1850_v63  ;;  %v1312_v6 = vshll.u32 %v1311_v14, 23  ;;  %v1210_v34 = vand.u32 2147483647, %v1209_v19  ;;  %vm1132_vm15 = vcmp.lt.s32.totalorder %v2194_v59, 0 }
 0x1d4   : > { %v1124_v37 = vsel %vm1122_vm11, %v1848_v56, %v1123_v28  ;;  %v1400_v43 = vshrl.u32 %v1399_v30, 30  ;;  %v1309_v13 = vor.u32 %v1308_v38, %v1307_v50  ;;  %v1212_v31 = vcvt.s32.f32 %v1205_v42 }
 0x1d5   : > { %v1128_v39 = vsel %vm1121_vm12, %v1124_v37, %v1127_v11  ;;  %v1313_v20 = vor.u32 4788187, %v1312_v6  ;;  %vm1236_vm0 = vcmp.lt.s32.totalorder %v2202_v8, 0  ;;  %v1394_v52 = vadd.s32 %v2388_v54, %v2386_v53 }
 0x1d6   : > { %v2401_v41 = vsel %vm1118_vm13, nan, %v1128_v39  ;;  %v1401_v44 = vshll.u32 %v1400_v43, 30  ;;  %v1316_v23 = vcvt.s32.f32 %v1309_v13  ;;  %v1213_v46 = vmul.f32 %v1212_v31, %v1210_v34 }
 0x1d7   : > { %v1314_v58 = vand.u32 2147483647, %v1313_v20  ;;  %vm2415_vm1 = vcmp.le.f32.partialorder %v1130_v3, 0.7853982  ;;  %vm2424_vm2 = vcmp.le.f32.partialorder %v1234_v12, 0.7853982 }
 0x1d8   : > { %v1402_v45 = vsub.s32 %v1398_v24, %v1401_v44  ;;  %v1214_v47 = vxor.u32 2147483648, %v1213_v46  ;;  %v1320_v7 = vsub.s32 4, %v2348_v57  ;;  %v1216_v14 = vsub.s32 4, %v2311_v51 }
 0x1d9   : > { %v1317_v26 = vmul.f32 %v1316_v23, %v1314_v58  ;;  %v1424_v28 = vsub.s32 4, %v1400_v43  ;;  %vm1340_vm3 = vcmp.lt.s32.totalorder %v2208_v17, 0  ;;  %vm1339_vm4 = vcmp.le.f32.partialorder %v1338_v49, 0.7853982 }
 0x1da   : > { %v1404_v22 = vsub.s32 0, %v1402_v45  ;;  %v1215_v35 = vsel %vm1132_vm15, %v1214_v47, %v1213_v46  ;;  %v1321_v12 = vsel %vm1236_vm0, %v1320_v7, %v2348_v57  ;;  %v1217_v10 = vsel %vm1132_vm15, %v1216_v14, %v2311_v51 }
 0x1db   : > { %v1318_v29 = vxor.u32 2147483648, %v1317_v26  ;;  %v1218_v61 = vsel %vm2415_vm1, %v2194_v59, %v1215_v35  ;;  %v1323_v11 = vsel %vm2424_vm2, 0, %v1321_v12  ;;  %v1219_v24 = vsel %vm2415_vm1, 0, %v1217_v10 }
 0x1dc   : > { %v1727_v48 = vmin.u32 %v1404_v22, %v1402_v45  ;;  %1851 = vcosq.f32 %v1218_v61  ;;  %v1425_v57 = vsel %vm1340_vm3, %v1424_v28, %v1400_v43  ;;  %v1327_v6 = vadd.s32 3, %v1323_v11 }
 0x1dd   : > { %v1319_v56 = vsel %vm1236_vm0, %v1318_v29, %v1317_v26  ;;  %v1223_v39 = vadd.s32 3, %v1219_v24  ;;  %v1427_v21 = vsel %vm1339_vm4, 0, %v1425_v57  ;;  %vm1222_vm15 = vweird.f32 %v2194_v59  ;;  %v297_v59 = vld [vmem:[%s2548_s3 + $0x8] sm:$0xff] }
 0x1de   : > { %v1406_v33 = vclz %v1727_v48  ;;  %v1322_v3 = vsel %vm2424_vm2, %v2202_v8, %v1319_v56  ;;  %v1431_v40 = vadd.s32 3, %v1427_v21  ;;  %v1328_v19 = vand.u32 3, %v1327_v6  ;;  %v1863_v56 = vld [vmem:[%s2072_s17] sm:$0xff] }
 0x1df   : > { %1853 = vcosq.f32 %v1322_v3  ;;  %v1224_v50 = vand.u32 3, %v1223_v39  ;;  %vm1430_vm0 = vweird.f32 %v2208_v17  ;;  %vm1452_vm1 = vcmask 130048  }
 0x1e0   : > { %v1728_v4 = vadd.s32 4294967294, %v1406_v33  ;;  %1855 = vsinq.f32 %v1322_v3  ;;  %v1432_v49 = vand.u32 3, %v1431_v40  ;;  %vm1330_vm5 = vcmp.eq.s32.totalorder %v1328_v19, 0 }
 0x1e1   : > { %1857 = vsinq.f32 %v1218_v61  ;;  %vm1333_vm6 = vcmp.eq.s32.totalorder %v1328_v19, 2  ;;  %vm1226_vm7 = vcmp.eq.s32.totalorder %v1224_v50, 0  ;;  %vm1229_vm8 = vcmp.eq.s32.totalorder %v1224_v50, 2 }
 0x1e2   : > { %vm1729_vm14 = vcmp.lt.s32.totalorder %v1728_v4, 0  ;;  %vm1329_vm9 = vcmp.lt.s32.totalorder %v1328_v19, 2  ;;  %vm1225_vm10 = vcmp.lt.s32.totalorder %v1224_v50, 2  ;;  %vm1437_vm11 = vcmp.eq.s32.totalorder %v1432_v49, 2 }
 0x1e3   : > { %v1409_v25 = vsel %vm1729_vm14, 0, %v1728_v4  ;;  %vm1434_vm12 = vcmp.eq.s32.totalorder %v1432_v49, 0  ;;  %vm1433_vm13 = vcmp.lt.s32.totalorder %v1432_v49, 2  ;;  %vm1326_vm14 = vweird.f32 %v2202_v8  ;;  %v296_v8 = vld [vmem:[%s2548_s3] sm:$0xff] }
 0x1e4   : > { %v1410_v18 = vsub.s32 32, %v1409_v25  ;;  %v1414_v55 = vsub.s32 4294967266, %v1409_v25  ;;  %v1411_v62 = vshll.u32 %v1402_v45, %v1409_v25 }
 0x1e6   : > { %v1412_v63 = vshrl.u32 %v1394_v52, %v1410_v18  ;;  %v1415_v1 = vadd.s32 127, %v1414_v55  ;;  %v1852_v2 = vpop.eup %1851 }
 0x1e7   : > { %v1230_v13 = vxor.u32 2147483648, %v1852_v2 }
 0x1e8   : > { %v1413_v54 = vor.u32 %v1412_v63, %v1411_v62  ;;  %v1416_v5 = vshll.u32 %v1415_v1, 23 }
 0x1e9   : > { %v1854_v51 = vpop.eup %1853 }
 0x1ea   : > { %v1417_v9 = vor.u32 4788187, %v1416_v5  ;;  %v1420_v16 = vcvt.s32.f32 %v1413_v54  ;;  %v1856_v30 = vpop.eup %1855  ;;  %v1334_v42 = vxor.u32 2147483648, %v1854_v51 }
 0x1eb   : > { %v1858_v38 = vpop.eup %1857  ;;  %v1331_v20 = vxor.u32 2147483648, %v1856_v30 }
 0x1ec   : > { %v1418_v15 = vand.u32 2147483647, %v1417_v9  ;;  %v1227_v44 = vxor.u32 2147483648, %v1858_v38  ;;  %v1335_v34 = vsel %vm1333_vm6, %v1334_v42, %v1856_v30  ;;  %v1231_v31 = vsel %vm1229_vm8, %v1230_v13, %v1858_v38 }
 0x1ed   : > { %v1332_v43 = vsel %vm1330_vm5, %v1854_v51, %v1331_v20 }
 0x1ee   : > { %v1421_v36 = vmul.f32 %v1420_v16, %v1418_v15  ;;  %v1228_v58 = vsel %vm1226_vm7, %v1852_v2, %v1227_v44  ;;  %v1336_v48 = vsel %vm1329_vm9, %v1332_v43, %v1335_v34 }
 0x1ef   : > { %v1232_v26 = vsel %vm1225_vm10, %v1228_v58, %v1231_v31  ;;  %v1337_v29 = vsel %vm1326_vm14, nan, %v1336_v48 }
 0x1f0   : > { %v1422_v27 = vxor.u32 2147483648, %v1421_v36  ;;  %v1233_v25 = vsel %vm1222_vm15, nan, %v1232_v26  ;;  %v1745_v18 = vpack.c.bf16 %v1337_v29, %v2401_v41  ;;  %v1539_v41 = vpop.permute.xlu0 %1538 }
 0x1f1   : > { %v1541_v60 = vmul.f32 %v1863_v56, %v1539_v41 }
 0x1f2   : > { %v1423_v32 = vsel %vm1340_vm3, %v1422_v27, %v1421_v36 }
 0x1f3   : > { %v1426_v37 = vsel %vm1339_vm4, %v2208_v17, %v1423_v32  ;;  %v1445_v17 = vpop.permute.xlu1 %1444 }
 0x1f4   : > { %1859 = vcosq.f32 %v1426_v37 }
 0x1f5   : > { %1861 = vsinq.f32 %v1426_v37 }
 0x1f7   : > { %v1450_v3 = vpop.permute.xlu1 %1449 }
 0x1fe   : > { %v1860_v45 = vpop.eup %1859 }
 0x1ff   : > { %v1862_v22 = vpop.eup %1861  ;;  %v1438_v23 = vxor.u32 2147483648, %v1860_v45 }
 0x200   : > { %v1435_v46 = vxor.u32 2147483648, %v1862_v22 }
 0x201   : > { %v1439_v33 = vsel %vm1437_vm11, %v1438_v23, %v1862_v22 }
 0x202   : > { %v1436_v47 = vsel %vm1434_vm12, %v1860_v45, %v1435_v46 }
 0x203   : > { %v1440_v4 = vsel %vm1433_vm13, %v1436_v47, %v1439_v33 }
 0x204   : > { %v1441_v35 = vsel %vm1430_vm0, nan, %v1440_v4 }
 0x205   : > { %v1743_v52 = vpack.c.bf16 %v1441_v35, %v1233_v25 }
 0x207   : > { %1744 = vmatprep.subr.bf16.mxu1 %v1743_v52 }
 0x208   : > { %1746 = vmatpush1.bf16.msra.mxu1 %v1745_v18 }
 0x20b   : > { %1730 = vmatmul.mubr.msk.f32.vlgmr.msra.gmra.mrb[4].mxu1 %vm1452_vm1, %v296_v8 }
 0x20c   : > { %1529 = vmatprep.mubr.f32.mxu1 %v1961_v0  ;;  %v1864_v0 = vld [vmem:[%s2072_s17 + $0x8] sm:$0xff] }
 0x20d   : > { %v1542_v1 = vmul.f32 %v1864_v0, %v1539_v41 }
 0x20f   : > { %1731 = vmatmul.mubr.msk.f32.gmra.mrb[6].mxu1 %vm1452_vm1, %v297_v59 }
 0x2de   : > { %v1525_v55 = vpop.f32.mrb[4].mxu1 }
 0x2df   : > { %v1526_v62 = vadd.f32 %v1525_v55, %v1445_v17  ;;  %v1527_v63 = vpop.f32.mrb[5].mxu1 }
 0x2e0   : > { %v1528_v61 = vadd.f32 %v1527_v63, %v1445_v17 }
 0x2e1   : > { %v1543_v53 = vadd.f32 %v1541_v60, %v1526_v62 }
 0x2e2   : > { %v1544_v54 = vadd.f32 %v1542_v1, %v1528_v61  ;;  %v1531_v5 = vpop.f32.mrb[6].mxu1 }
 0x2e3   : > { %1545 = vst [vmem:[%s275_s16] sm:$0xff] %v1543_v53  ;;  %v1532_v7 = vadd.f32 %v1531_v5, %v1450_v3  ;;  %v1533_v9 = vpop.f32.mrb[7].mxu1 }
 0x2e4   : > { %1546 = vst [vmem:[%s275_s16 + $0x8] sm:$0xff] %v1544_v54  ;;  %v1534_v14 = vadd.f32 %v1533_v9, %v1450_v3 }
 0x2e5   : > { %1547 = vst [vmem:[%s2465_s19] sm:$0xff] %v1532_v7 }
 0x2e6   : > { %1878 = shalt.err (!%p1875_p3)
}
 0x2e7   : > { %s1879_s15 = scalar_lea.hbm %s2471_s28, 256  ;;  %s1883_s23 = scalar_lea.hbm %s2551_s6, 1024 }
 0x2e8   : > { %p1880_p4 = scmp.ne.s32.totalorder %s2471_s28, %s1879_s15  ;;  %p1884_p9 = scmp.lt.u32.totalorder %s2471_s28, %s2551_s6 }
 0x2e9   : > { %p1885_p10 = scmp.lt.u32.totalorder %s1883_s23, %s1879_s15  ;;  %p1887_p12 = scmp.lt.u32.totalorder %s1879_s15, %s2471_s28 }
 0x2ea   : > { %p1881_p7 = pnand %p1880_p4, %p2055_p5 }
 0x2eb   : > { %p1886_p11 = por %p1885_p10, %p1884_p9 }
 0x2ec   : > { %p1882_p8 = pneg %p1881_p7 }
 0x2ed   : > { %p1888_p13 = por %p1887_p12, %p1886_p11 }
 0x2ef   : > { %p1889_p0 = pnand %p1888_p13, %p1882_p8 }
 0x2f1   : > { %1892 = shalt.err (!%p1889_p0)
}
 0x2f2   : > { %1787 = dma.vmem_to_hbm [thread:$0]  (%p2055_p5), %s2473_s18, 256, %s2471_s28, %s1550_s8   ;;  %1548 = vst [vmem:[%s2465_s19 + $0x8] sm:$0xff] %v1534_v14 }
 0x2f3   : > { %s1555_s9 = scalar_lea.sflag [#allocation5], %s2459_s13  ;;  %s1893_s22 = scalar_lea.vmem %s2480_s20, 256 }
 0x2f4   : > { %p1894_p1 = scmp.ne.s32.totalorder %s2480_s20, %s1893_s22  ;;  %s1976_s15 = smov [#allocation4]  }
 0x2f5   : > { %s1897_s16 = sshll.u32 %s1976_s15, 4  ;;  %s1898_s16 = int_to_ptr.vmem [resolvable:$false] %s1897_s16 }
 0x2f6   : > { %p1895_p2 = pnand %p1894_p1, %p2055_p5  ;;  %s1899_s17 = scalar_lea.vmem %s1898_s16, 512 }
 0x2f7   : > { %p1900_p4 = scmp.lt.s32.totalorder %s2480_s20, %s1898_s16  ;;  %p1901_p7 = scmp.lt.s32.totalorder %s1899_s17, %s1893_s22 }
 0x2f8   : > { %p1896_p3 = pneg %p1895_p2 }
 0x2f9   : > { %p1902_p8 = por %p1901_p7, %p1900_p4 }
 0x2fb   : > { %p1903_p9 = pnand %p1902_p8, %p1896_p3 }
 0x2fd   : > { %1906 = shalt.err (!%p1903_p9)
}
 0x2fe   : > { %s1907_s13 = scalar_lea.hbm %s2478_s29, 256  ;;  %s1911_s28 = scalar_lea.hbm %s2552_s7, 1024 }
 0x2ff   : > { %p1908_p10 = scmp.ne.s32.totalorder %s2478_s29, %s1907_s13  ;;  %p1912_p13 = scmp.lt.u32.totalorder %s2478_s29, %s2552_s7 }
 0x300   : > { %p1913_p0 = scmp.lt.u32.totalorder %s1911_s28, %s1907_s13  ;;  %p1915_p2 = scmp.lt.u32.totalorder %s1907_s13, %s2478_s29 }
 0x301   : > { %p1909_p11 = pnand %p1908_p10, %p2055_p5 }
 0x302   : > { %p1914_p1 = por %p1913_p0, %p1912_p13 }
 0x303   : > { %p1910_p12 = pneg %p1909_p11 }
 0x304   : > { %p1916_p3 = por %p1915_p2, %p1914_p1 }
 0x306   : > { %p1917_p4 = pnand %p1916_p3, %p1910_p12 }
 0x308   : > { %1920 = shalt.err (!%p1917_p4)
}
 0x309   : > { %1788 = dma.vmem_to_hbm [thread:$0]  (%p2055_p5), %s2480_s20, 256, %s2478_s29, %s1555_s9  }
 0x30a PF: > { %p1798_p7 = scmp.ge.s32.totalorder %s1959_s27, 2  ;;  %s1595_s14 = sand.u32 1, %s1947_s24  }
 0x30b   : > { %s1596_s21 = scalar_lea.sflag [#allocation3], %s1595_s14 }
 0x30c   : > { %p1792_p8 = pnand %p1798_p7, %p2059_p6 }
 0x30e   : > { %1938 = dma.done.wait (!%p1792_p8), %s1596_s21, 256  }
 0x30f   : > { %1940 = vsyncadd (!%p1792_p8), %s1596_s21, 4294967040  ;;  %s1605_s22 = scalar_lea.sflag [#allocation5], %s1595_s14 }
 0x310   : > { %1942 = dma.done.wait (!%p1792_p8), %s1605_s22, 256  }
 0x311   : > { %1944 = vsyncadd (!%p1792_p8), %s1605_s22, 4294967040  ;;  %p21_p5 = scmp.ge.s32.totalorder %s2042_s30, 6   ;;  %s2561_s24 = smov %s1951_s25 }
 0x312   : > { %s2562_s25 = smov %s1955_s26  ;;  %s2563_s26 = smov %s2053_s10 }
 0x313   : > { %s2564_s27 = smov %s2042_s30  ;;  %23 = sbr.rel (!%p21_p5) target bundleno = 5 (0x5), region = 102 }
 0x31a   :  { %1610 = vsyncpa [#allocation3], 1 }
 0x31b   :  { %1612 = vsyncpa [#allocation3 + $0x1], 1 }
 0x31c   :  { %1613 = vsyncpa [#allocation5], 1 }
 0x31d   :  { %1615 = vsyncpa [#allocation5 + $0x1], 1 }

</bundles_post_ra>
